<compile_context>
chip_gen: v5e
topology: v5e:2x2
jax: 0.10.0
libtpu: 0.0.40
codegen_flags: <defaults>
</compile_context>

<pallas_src>
import jax
import jax.numpy as jnp
from jax.experimental import pallas as pl
from jax.experimental.pallas import tpu as pltpu


# ----------------------------------------------------------------------------
# Fused kernel: all layers + fc in one pallas_call (no grid, everything in VMEM)
# ----------------------------------------------------------------------------
def make_fused_kernel(seq, Bp, H, use_ir_flags):
    L = len(use_ir_flags)
    G3, G4 = 3 * H, 4 * H

    def kernel(*refs):
        it = iter(refs)
        # ---- inputs -------------------------------------------------------
        x2d_ref = next(it)                      # (seq*Bp, In0)  row t*Bp+b = x[t, b]
        h0_ref = next(it)                       # (Bp, H)
        c0_ref = next(it)                       # (Bp, H)
        layer_refs = [(next(it), next(it), next(it)) for _ in range(L)]
        #   per layer: w_in (In, 4H[+H]) = [W_ii3 | 0 | (W_ir)]
        #              b_in (1,  4H[+H]) = [b_ii+b_ih+b_ic | b_hh | (0)]
        #              w_rec (2H, 4H)    = [[W_ih3 | W_hh], [W_ic3 | 0]]
        fcw_ref = next(it)                      # (H, NCLS)
        fcb_ref = next(it)                      # (1, NCLS)
        # ---- outputs ------------------------------------------------------
        out_ref = next(it)                      # (seq*Bp, NCLS)
        hN_ref = next(it)                       # (Bp, H)
        cN_ref = next(it)                       # (Bp, H)

        h = h0_ref[...]
        c = c0_ref[...]
        xin = x2d_ref[...]                      # current layer's input sequence

        for l in range(L):
            w_in_ref, b_in_ref, w_rec_ref = layer_refs[l]
            use_ir = use_ir_flags[l]
            w_rec = w_rec_ref[...]

            # One batched, lane-dense MXU matmul for every input-dependent term
            # of every time step; ALL biases folded in here, off the serial path.
            xproj = (jnp.dot(xin.astype(w_in_ref.dtype), w_in_ref[...],
                             preferred_element_type=jnp.float32)
                     + b_in_ref[...])           # (seq*Bp, 4H[+H])

            # Fully unrolled time recurrence (seq is small & static): exactly
            # ONE recurrent dot + one add + 3 EUP pushes per step.
            outs = []
            for t in range(seq):
                xp = xproj[t * Bp:(t + 1) * Bp, :]          # whole-sublane-tile slice
                hc = jnp.concatenate([h, c], axis=1)        # (Bp, 2H) lane concat (XLU)
                rec = jnp.dot(hc.astype(w_rec.dtype), w_rec,
                              preferred_element_type=jnp.float32)   # (Bp, 4H)
                pre = xp[:, :G4] + rec
                g = jax.nn.sigmoid(pre[:, :G3])             # i | f | o in one EUP pass
                cellgate = jnp.tanh(pre[:, G3:G4])
                c = g[:, H:2 * H] * c + g[:, 0:H] * cellgate
                ry = jnp.tanh(c)
                res = xp[:, G4:G4 + H] if use_ir else xin[t * Bp:(t + 1) * Bp, :]
                h = g[:, 2 * H:G3] * (ry + res)
                outs.append(h)

            # Next layer's input sequence stays in vregs (tile-aligned concat).
            xin = jnp.concatenate(outs, axis=0)             # (seq*Bp, H)

        hN_ref[...] = h
        cN_ref[...] = c
        # fc over every (t, b) row; the wrapper selects the `input[:, -1, :]`
        # rows (numerically identical, keeps the kernel free of row gathers).
        out_ref[...] = (jnp.dot(xin.astype(fcw_ref.dtype), fcw_ref[...],
                                preferred_element_type=jnp.float32)
                        + fcb_ref[...])

    return kernel


def res_lstm_forward(x, params, hidden=None):
    seq, B, In = x.shape
    H = params["hidden_size"]
    ncls = params["fc_w_t"].shape[-1]
    Bp = max(8, ((B + 7) // 8) * 8)             # pad batch to the 8-sublane tile
    if hidden is None:
        h0 = jnp.zeros((B, H), jnp.float32)
        c0 = jnp.zeros((B, H), jnp.float32)
    else:
        h0, c0 = hidden

    pad = Bp - B
    xP = jnp.pad(x, ((0, 0), (0, pad), (0, 0))).reshape(seq * Bp, In)
    h0P = jnp.pad(h0, ((0, pad), (0, 0)))
    c0P = jnp.pad(c0, ((0, pad), (0, 0)))

    use_ir_flags = tuple(lp["use_ir"] for lp in params["layers"])
    kernel = make_fused_kernel(seq, Bp, H, use_ir_flags)

    inputs = [xP, h0P, c0P]
    for lp in params["layers"]:
        inputs += [lp["w_in"], lp["b_in"], lp["w_rec"]]
    inputs += [params["fc_w_t"], params["fc_b"]]

    vmem = pl.BlockSpec(memory_space=pltpu.MemorySpace.VMEM)
    out_full, hN, cN = pl.pallas_call(
        kernel,
        out_shape=(jax.ShapeDtypeStruct((seq * Bp, ncls), jnp.float32),
                   jax.ShapeDtypeStruct((Bp, H), jnp.float32),
                   jax.ShapeDtypeStruct((Bp, H), jnp.float32)),
        in_specs=[vmem] * len(inputs),
        out_specs=(vmem, vmem, vmem),
        # Total residency is <1 MiB; fits the scoped default on v5e/v6e/v7x.
        compiler_params=pltpu.CompilerParams(vmem_limit_bytes=32 * 1024 * 1024),
    )(*inputs)

    # PyTorch `input[:, -1, :]` on the time-major output: last *batch* row of
    # every time step (row index B-1 of each padded batch block).
    out = out_full.reshape(seq, Bp, ncls)[:, B - 1, :]
    return out, (hN[:B], cN[:B])


# ----------------------------------------------------------------------------
# Parameters: raw (torch-shaped) + fused kernel layout
# ----------------------------------------------------------------------------
def init_raw_params(key, input_size, hidden_size, num_classes, num_layers):
    raw = {"hidden_size": hidden_size, "layers": []}
    for i in range(num_layers):
        in_sz = input_size if i == 0 else hidden_size
        keys = jax.random.split(jax.random.fold_in(key, i), 9)
        n = jax.random.normal
        raw["layers"].append({
            "in_size": in_sz,
            "w_ii": n(keys[0], (3 * hidden_size, in_sz), jnp.float32),
            "w_ic": n(keys[1], (3 * hidden_size, hidden_size), jnp.float32),
            "w_ih": n(keys[2], (3 * hidden_size, hidden_size), jnp.float32),
            "b_ii": n(keys[3], (3 * hidden_size,), jnp.float32),
            "b_ic": n(keys[4], (3 * hidden_size,), jnp.float32),
            "b_ih": n(keys[5], (3 * hidden_size,), jnp.float32),
            "w_hh": n(keys[6], (hidden_size, hidden_size), jnp.float32),
            "b_hh": n(keys[7], (hidden_size,), jnp.float32),
            "w_ir": n(keys[8], (hidden_size, in_sz), jnp.float32),
        })
    kfc = jax.random.fold_in(key, 1000)
    raw["fc_w"] = jax.random.normal(kfc, (num_classes, hidden_size), jnp.float32) * 0.1
    raw["fc_b"] = jax.random.normal(jax.random.fold_in(kfc, 1), (num_classes,),
                                    jnp.float32) * 0.1
    return raw


def fuse_params(raw, matmul_dtype=jnp.float32):
    """Pre-transpose / concatenate weights into the fused kernel layout.

    matmul_dtype=jnp.bfloat16 enables single-pass MXU matmuls (elementwise math
    stays f32 in-kernel); left at f32 so the 1e-3 check vs the f32 reference
    stays robust with unit-variance randn weights.
    """
    H = raw["hidden_size"]
    fused = {"hidden_size": H, "layers": []}
    for lp in raw["layers"]:
        in_sz = lp["in_size"]
        use_ir = in_sz != H
        # Input projection weight: [W_ii3 | 0 (bhh slot) | (W_ir)]  -> (In, 4H[+H])
        blocks = [lp["w_ii"].T, jnp.zeros((in_sz, H), jnp.float32)]
        if use_ir:
            blocks.append(lp["w_ir"].T)
        w_in = jnp.concatenate(blocks, axis=1)
        # Folded bias: [b_ii+b_ih+b_ic | b_hh | (0)]
        b_blocks = [(lp["b_ii"] + lp["b_ih"] + lp["b_ic"]).reshape(1, 3 * H),
                    lp["b_hh"].reshape(1, H)]
        if use_ir:
            b_blocks.append(jnp.zeros((1, H), jnp.float32))
        b_in = jnp.concatenate(b_blocks, axis=1)
        # Fused recurrent weight for hc=[h|c]: [[W_ih3 | W_hh], [W_ic3 | 0]] -> (2H, 4H)
        top = jnp.concatenate([lp["w_ih"].T, lp["w_hh"].T], axis=1)
        bot = jnp.concatenate([lp["w_ic"].T, jnp.zeros((H, H), jnp.float32)], axis=1)
        w_rec = jnp.concatenate([top, bot], axis=0)
        fused["layers"].append({
            "use_ir": use_ir,
            "w_in": w_in.astype(matmul_dtype),
            "b_in": b_in,                              # bias stays f32
            "w_rec": w_rec.astype(matmul_dtype),
        })
    fused["fc_w_t"] = raw["fc_w"].T.astype(matmul_dtype)
    fused["fc_b"] = raw["fc_b"].reshape(1, -1)
    return fused


# ----------------------------------------------------------------------------
# Pure-JAX reference (mirrors the PyTorch forward) for verification
# ----------------------------------------------------------------------------
def ref_forward(x, raw, hidden=None):
    seq, B, _ = x.shape
    H = raw["hidden_size"]
    hp = jax.lax.Precision.HIGHEST
    h = jnp.zeros((B, H), jnp.float32) if hidden is None else hidden[0]
    c = jnp.zeros((B, H), jnp.float32) if hidden is None else hidden[1]
    for lp in raw["layers"]:
        outs = []
        for t in range(seq):
            xt = x[t]
            ifo = (jnp.dot(xt, lp["w_ii"].T, precision=hp) + lp["b_ii"]
                   + jnp.dot(h, lp["w_ih"].T, precision=hp) + lp["b_ih"]
                   + jnp.dot(c, lp["w_ic"].T, precision=hp) + lp["b_ic"])
            i_g = jax.nn.sigmoid(ifo[:, 0:H])
            f_g = jax.nn.sigmoid(ifo[:, H:2 * H])
            o_g = jax.nn.sigmoid(ifo[:, 2 * H:3 * H])
            g_g = jnp.tanh(jnp.dot(h, lp["w_hh"].T, precision=hp) + lp["b_hh"])
            c = f_g * c + i_g * g_g
            ry = jnp.tanh(c)
            res = xt if lp["in_size"] == H else jnp.dot(xt, lp["w_ir"].T, precision=hp)
            h = o_g * (ry + res)
            outs.append(h)
        x = jnp.stack(outs)
    last = x[:, -1, :]   # literal PyTorch semantics (last batch element)
    out = jnp.dot(last, raw["fc_w"].T, precision=hp) + raw["fc_b"]
    return out, (h, c)


if __name__ == "__main__":
    SEQ, BATCH, IN, HID, NCLS, NLAYERS = 8, 2, 16, 32, 10, 2

    key = jax.random.PRNGKey(0)
    kx, kp = jax.random.split(key)
    x = jax.random.normal(kx, (SEQ, BATCH, IN), jnp.float32)

    raw_params = init_raw_params(kp, IN, HID, NCLS, NLAYERS)
    fused_params = fuse_params(raw_params)

    out, (hN, cN) = res_lstm_forward(x, fused_params)
    out = jax.block_until_ready(out)
    hN = jax.block_until_ready(hN)
    cN = jax.block_until_ready(cN)

    ref_out, (ref_h, ref_c) = ref_forward(x, raw_params)
    assert out.shape == (SEQ, NCLS)
    assert hN.shape == (BATCH, HID) and cN.shape == (BATCH, HID)
    assert jnp.allclose(out, ref_out, atol=1e-3, rtol=1e-3), \
        float(jnp.max(jnp.abs(out - ref_out)))
    assert jnp.allclose(hN, ref_h, atol=1e-3, rtol=1e-3)
    assert jnp.allclose(cN, ref_c, atol=1e-3, rtol=1e-3)

    print("KERNEL_OK")
</pallas_src>

<mosaic_0001>
module attributes {stable_mosaic.version = 11 : i64} {
  func.func @kernel(%arg0: memref<64x16xf32, #tpu.memory_space<vmem>>, %arg1: memref<8x32xf32, #tpu.memory_space<vmem>>, %arg2: memref<8x32xf32, #tpu.memory_space<vmem>>, %arg3: memref<16x160xf32, #tpu.memory_space<vmem>>, %arg4: memref<1x160xf32, #tpu.memory_space<vmem>>, %arg5: memref<64x128xf32, #tpu.memory_space<vmem>>, %arg6: memref<32x128xf32, #tpu.memory_space<vmem>>, %arg7: memref<1x128xf32, #tpu.memory_space<vmem>>, %arg8: memref<64x128xf32, #tpu.memory_space<vmem>>, %arg9: memref<32x10xf32, #tpu.memory_space<vmem>>, %arg10: memref<1x10xf32, #tpu.memory_space<vmem>>, %arg11: memref<64x10xf32, #tpu.memory_space<vmem>>, %arg12: memref<8x32xf32, #tpu.memory_space<vmem>>, %arg13: memref<8x32xf32, #tpu.memory_space<vmem>>) attributes {dimension_semantics = [], scalar_prefetch = 0 : i64, scratch_operands = 0 : i64, tpu.core_type = #tpu.core_type<tc>} {
    %c0 = arith.constant 0 : index
    %c0_0 = arith.constant 0 : index
    %0 = vector.load %arg1[%c0, %c0_0] : memref<8x32xf32, #tpu.memory_space<vmem>>, vector<8x32xf32>
    %c0_1 = arith.constant 0 : index
    %c0_2 = arith.constant 0 : index
    %1 = vector.load %arg2[%c0_1, %c0_2] : memref<8x32xf32, #tpu.memory_space<vmem>>, vector<8x32xf32>
    %c0_3 = arith.constant 0 : index
    %c0_4 = arith.constant 0 : index
    %2 = vector.load %arg0[%c0_3, %c0_4] : memref<64x16xf32, #tpu.memory_space<vmem>>, vector<64x16xf32>
    %c0_5 = arith.constant 0 : index
    %c0_6 = arith.constant 0 : index
    %3 = vector.load %arg5[%c0_5, %c0_6] : memref<64x128xf32, #tpu.memory_space<vmem>>, vector<64x128xf32>
    %c0_7 = arith.constant 0 : index
    %c0_8 = arith.constant 0 : index
    %4 = vector.load %arg3[%c0_7, %c0_8] : memref<16x160xf32, #tpu.memory_space<vmem>>, vector<16x160xf32>
    %cst = arith.constant dense<0.000000e+00> : vector<64x160xf32>
    %5 = tpu.matmul %2, %4, %cst {dimension_numbers = #tpu.dot_dimension_numbers<[1], [0], [0], [1], [0, 0, 1, 1], [], []>} : vector<64x16xf32>, vector<16x160xf32>, vector<64x160xf32> -> vector<64x160xf32>
    %c0_9 = arith.constant 0 : index
    %c0_10 = arith.constant 0 : index
    %6 = vector.load %arg4[%c0_9, %c0_10] : memref<1x160xf32, #tpu.memory_space<vmem>>, vector<1x160xf32>
    %7 = vector.broadcast %6 : vector<1x160xf32> to vector<64x160xf32>
    %8 = arith.addf %5, %7 : vector<64x160xf32>
    %9 = vector.extract_strided_slice %8 {offsets = [0, 0], sizes = [8, 160], strides = [1, 1]} : vector<64x160xf32> to vector<8x160xf32>
    %10 = tpu.concatenate %0, %1 in 1 : vector<8x32xf32>, vector<8x32xf32> -> vector<8x64xf32>
    %cst_11 = arith.constant dense<0.000000e+00> : vector<8x128xf32>
    %11 = tpu.matmul %10, %3, %cst_11 {dimension_numbers = #tpu.dot_dimension_numbers<[1], [0], [0], [1], [0, 0, 1, 1], [], []>} : vector<8x64xf32>, vector<64x128xf32>, vector<8x128xf32> -> vector<8x128xf32>
    %12 = vector.extract_strided_slice %9 {offsets = [0, 0], sizes = [8, 128], strides = [1, 1]} : vector<8x160xf32> to vector<8x128xf32>
    %13 = arith.addf %12, %11 : vector<8x128xf32>
    %14 = vector.extract_strided_slice %13 {offsets = [0, 0], sizes = [8, 96], strides = [1, 1]} : vector<8x128xf32> to vector<8x96xf32>
    %15 = arith.negf %14 : vector<8x96xf32>
    %16 = math.exp %15 : vector<8x96xf32>
    %cst_12 = arith.constant 1.000000e+00 : f32
    %17 = vector.broadcast %cst_12 : f32 to vector<8x96xf32>
    %18 = arith.addf %17, %16 : vector<8x96xf32>
    %19 = arith.divf %17, %18 : vector<8x96xf32>
    %20 = vector.extract_strided_slice %13 {offsets = [0, 96], sizes = [8, 32], strides = [1, 1]} : vector<8x128xf32> to vector<8x32xf32>
    %21 = math.tanh %20 : vector<8x32xf32>
    %22 = vector.extract_strided_slice %19 {offsets = [0, 32], sizes = [8, 32], strides = [1, 1]} : vector<8x96xf32> to vector<8x32xf32>
    %23 = arith.mulf %22, %1 : vector<8x32xf32>
    %24 = vector.extract_strided_slice %19 {offsets = [0, 0], sizes = [8, 32], strides = [1, 1]} : vector<8x96xf32> to vector<8x32xf32>
    %25 = arith.mulf %24, %21 : vector<8x32xf32>
    %26 = arith.addf %23, %25 : vector<8x32xf32>
    %27 = math.tanh %26 : vector<8x32xf32>
    %28 = vector.extract_strided_slice %9 {offsets = [0, 128], sizes = [8, 32], strides = [1, 1]} : vector<8x160xf32> to vector<8x32xf32>
    %29 = vector.extract_strided_slice %19 {offsets = [0, 64], sizes = [8, 32], strides = [1, 1]} : vector<8x96xf32> to vector<8x32xf32>
    %30 = arith.addf %27, %28 : vector<8x32xf32>
    %31 = arith.mulf %29, %30 : vector<8x32xf32>
    %32 = vector.extract_strided_slice %8 {offsets = [8, 0], sizes = [8, 160], strides = [1, 1]} : vector<64x160xf32> to vector<8x160xf32>
    %33 = tpu.concatenate %31, %26 in 1 : vector<8x32xf32>, vector<8x32xf32> -> vector<8x64xf32>
    %cst_13 = arith.constant dense<0.000000e+00> : vector<8x128xf32>
    %34 = tpu.matmul %33, %3, %cst_13 {dimension_numbers = #tpu.dot_dimension_numbers<[1], [0], [0], [1], [0, 0, 1, 1], [], []>} : vector<8x64xf32>, vector<64x128xf32>, vector<8x128xf32> -> vector<8x128xf32>
    %35 = vector.extract_strided_slice %32 {offsets = [0, 0], sizes = [8, 128], strides = [1, 1]} : vector<8x160xf32> to vector<8x128xf32>
    %36 = arith.addf %35, %34 : vector<8x128xf32>
    %37 = vector.extract_strided_slice %36 {offsets = [0, 0], sizes = [8, 96], strides = [1, 1]} : vector<8x128xf32> to vector<8x96xf32>
    %38 = arith.negf %37 : vector<8x96xf32>
    %39 = math.exp %38 : vector<8x96xf32>
    %cst_14 = arith.constant 1.000000e+00 : f32
    %40 = vector.broadcast %cst_14 : f32 to vector<8x96xf32>
    %41 = arith.addf %40, %39 : vector<8x96xf32>
    %42 = arith.divf %40, %41 : vector<8x96xf32>
    %43 = vector.extract_strided_slice %36 {offsets = [0, 96], sizes = [8, 32], strides = [1, 1]} : vector<8x128xf32> to vector<8x32xf32>
    %44 = math.tanh %43 : vector<8x32xf32>
    %45 = vector.extract_strided_slice %42 {offsets = [0, 32], sizes = [8, 32], strides = [1, 1]} : vector<8x96xf32> to vector<8x32xf32>
    %46 = arith.mulf %45, %26 : vector<8x32xf32>
    %47 = vector.extract_strided_slice %42 {offsets = [0, 0], sizes = [8, 32], strides = [1, 1]} : vector<8x96xf32> to vector<8x32xf32>
    %48 = arith.mulf %47, %44 : vector<8x32xf32>
    %49 = arith.addf %46, %48 : vector<8x32xf32>
    %50 = math.tanh %49 : vector<8x32xf32>
    %51 = vector.extract_strided_slice %32 {offsets = [0, 128], sizes = [8, 32], strides = [1, 1]} : vector<8x160xf32> to vector<8x32xf32>
    %52 = vector.extract_strided_slice %42 {offsets = [0, 64], sizes = [8, 32], strides = [1, 1]} : vector<8x96xf32> to vector<8x32xf32>
    %53 = arith.addf %50, %51 : vector<8x32xf32>
    %54 = arith.mulf %52, %53 : vector<8x32xf32>
    %55 = vector.extract_strided_slice %8 {offsets = [16, 0], sizes = [8, 160], strides = [1, 1]} : vector<64x160xf32> to vector<8x160xf32>
    %56 = tpu.concatenate %54, %49 in 1 : vector<8x32xf32>, vector<8x32xf32> -> vector<8x64xf32>
    %cst_15 = arith.constant dense<0.000000e+00> : vector<8x128xf32>
    %57 = tpu.matmul %56, %3, %cst_15 {dimension_numbers = #tpu.dot_dimension_numbers<[1], [0], [0], [1], [0, 0, 1, 1], [], []>} : vector<8x64xf32>, vector<64x128xf32>, vector<8x128xf32> -> vector<8x128xf32>
    %58 = vector.extract_strided_slice %55 {offsets = [0, 0], sizes = [8, 128], strides = [1, 1]} : vector<8x160xf32> to vector<8x128xf32>
    %59 = arith.addf %58, %57 : vector<8x128xf32>
    %60 = vector.extract_strided_slice %59 {offsets = [0, 0], sizes = [8, 96], strides = [1, 1]} : vector<8x128xf32> to vector<8x96xf32>
    %61 = arith.negf %60 : vector<8x96xf32>
    %62 = math.exp %61 : vector<8x96xf32>
    %cst_16 = arith.constant 1.000000e+00 : f32
    %63 = vector.broadcast %cst_16 : f32 to vector<8x96xf32>
    %64 = arith.addf %63, %62 : vector<8x96xf32>
    %65 = arith.divf %63, %64 : vector<8x96xf32>
    %66 = vector.extract_strided_slice %59 {offsets = [0, 96], sizes = [8, 32], strides = [1, 1]} : vector<8x128xf32> to vector<8x32xf32>
    %67 = math.tanh %66 : vector<8x32xf32>
    %68 = vector.extract_strided_slice %65 {offsets = [0, 32], sizes = [8, 32], strides = [1, 1]} : vector<8x96xf32> to vector<8x32xf32>
    %69 = arith.mulf %68, %49 : vector<8x32xf32>
    %70 = vector.extract_strided_slice %65 {offsets = [0, 0], sizes = [8, 32], strides = [1, 1]} : vector<8x96xf32> to vector<8x32xf32>
    %71 = arith.mulf %70, %67 : vector<8x32xf32>
    %72 = arith.addf %69, %71 : vector<8x32xf32>
    %73 = math.tanh %72 : vector<8x32xf32>
    %74 = vector.extract_strided_slice %55 {offsets = [0, 128], sizes = [8, 32], strides = [1, 1]} : vector<8x160xf32> to vector<8x32xf32>
    %75 = vector.extract_strided_slice %65 {offsets = [0, 64], sizes = [8, 32], strides = [1, 1]} : vector<8x96xf32> to vector<8x32xf32>
    %76 = arith.addf %73, %74 : vector<8x32xf32>
    %77 = arith.mulf %75, %76 : vector<8x32xf32>
    %78 = vector.extract_strided_slice %8 {offsets = [24, 0], sizes = [8, 160], strides = [1, 1]} : vector<64x160xf32> to vector<8x160xf32>
    %79 = tpu.concatenate %77, %72 in 1 : vector<8x32xf32>, vector<8x32xf32> -> vector<8x64xf32>
    %cst_17 = arith.constant dense<0.000000e+00> : vector<8x128xf32>
    %80 = tpu.matmul %79, %3, %cst_17 {dimension_numbers = #tpu.dot_dimension_numbers<[1], [0], [0], [1], [0, 0, 1, 1], [], []>} : vector<8x64xf32>, vector<64x128xf32>, vector<8x128xf32> -> vector<8x128xf32>
    %81 = vector.extract_strided_slice %78 {offsets = [0, 0], sizes = [8, 128], strides = [1, 1]} : vector<8x160xf32> to vector<8x128xf32>
    %82 = arith.addf %81, %80 : vector<8x128xf32>
    %83 = vector.extract_strided_slice %82 {offsets = [0, 0], sizes = [8, 96], strides = [1, 1]} : vector<8x128xf32> to vector<8x96xf32>
    %84 = arith.negf %83 : vector<8x96xf32>
    %85 = math.exp %84 : vector<8x96xf32>
    %cst_18 = arith.constant 1.000000e+00 : f32
    %86 = vector.broadcast %cst_18 : f32 to vector<8x96xf32>
    %87 = arith.addf %86, %85 : vector<8x96xf32>
    %88 = arith.divf %86, %87 : vector<8x96xf32>
    %89 = vector.extract_strided_slice %82 {offsets = [0, 96], sizes = [8, 32], strides = [1, 1]} : vector<8x128xf32> to vector<8x32xf32>
    %90 = math.tanh %89 : vector<8x32xf32>
    %91 = vector.extract_strided_slice %88 {offsets = [0, 32], sizes = [8, 32], strides = [1, 1]} : vector<8x96xf32> to vector<8x32xf32>
    %92 = arith.mulf %91, %72 : vector<8x32xf32>
    %93 = vector.extract_strided_slice %88 {offsets = [0, 0], sizes = [8, 32], strides = [1, 1]} : vector<8x96xf32> to vector<8x32xf32>
    %94 = arith.mulf %93, %90 : vector<8x32xf32>
    %95 = arith.addf %92, %94 : vector<8x32xf32>
    %96 = math.tanh %95 : vector<8x32xf32>
    %97 = vector.extract_strided_slice %78 {offsets = [0, 128], sizes = [8, 32], strides = [1, 1]} : vector<8x160xf32> to vector<8x32xf32>
    %98 = vector.extract_strided_slice %88 {offsets = [0, 64], sizes = [8, 32], strides = [1, 1]} : vector<8x96xf32> to vector<8x32xf32>
    %99 = arith.addf %96, %97 : vector<8x32xf32>
    %100 = arith.mulf %98, %99 : vector<8x32xf32>
    %101 = vector.extract_strided_slice %8 {offsets = [32, 0], sizes = [8, 160], strides = [1, 1]} : vector<64x160xf32> to vector<8x160xf32>
    %102 = tpu.concatenate %100, %95 in 1 : vector<8x32xf32>, vector<8x32xf32> -> vector<8x64xf32>
    %cst_19 = arith.constant dense<0.000000e+00> : vector<8x128xf32>
    %103 = tpu.matmul %102, %3, %cst_19 {dimension_numbers = #tpu.dot_dimension_numbers<[1], [0], [0], [1], [0, 0, 1, 1], [], []>} : vector<8x64xf32>, vector<64x128xf32>, vector<8x128xf32> -> vector<8x128xf32>
    %104 = vector.extract_strided_slice %101 {offsets = [0, 0], sizes = [8, 128], strides = [1, 1]} : vector<8x160xf32> to vector<8x128xf32>
    %105 = arith.addf %104, %103 : vector<8x128xf32>
    %106 = vector.extract_strided_slice %105 {offsets = [0, 0], sizes = [8, 96], strides = [1, 1]} : vector<8x128xf32> to vector<8x96xf32>
    %107 = arith.negf %106 : vector<8x96xf32>
    %108 = math.exp %107 : vector<8x96xf32>
    %cst_20 = arith.constant 1.000000e+00 : f32
    %109 = vector.broadcast %cst_20 : f32 to vector<8x96xf32>
    %110 = arith.addf %109, %108 : vector<8x96xf32>
    %111 = arith.divf %109, %110 : vector<8x96xf32>
    %112 = vector.extract_strided_slice %105 {offsets = [0, 96], sizes = [8, 32], strides = [1, 1]} : vector<8x128xf32> to vector<8x32xf32>
    %113 = math.tanh %112 : vector<8x32xf32>
    %114 = vector.extract_strided_slice %111 {offsets = [0, 32], sizes = [8, 32], strides = [1, 1]} : vector<8x96xf32> to vector<8x32xf32>
    %115 = arith.mulf %114, %95 : vector<8x32xf32>
    %116 = vector.extract_strided_slice %111 {offsets = [0, 0], sizes = [8, 32], strides = [1, 1]} : vector<8x96xf32> to vector<8x32xf32>
    %117 = arith.mulf %116, %113 : vector<8x32xf32>
    %118 = arith.addf %115, %117 : vector<8x32xf32>
    %119 = math.tanh %118 : vector<8x32xf32>
    %120 = vector.extract_strided_slice %101 {offsets = [0, 128], sizes = [8, 32], strides = [1, 1]} : vector<8x160xf32> to vector<8x32xf32>
    %121 = vector.extract_strided_slice %111 {offsets = [0, 64], sizes = [8, 32], strides = [1, 1]} : vector<8x96xf32> to vector<8x32xf32>
    %122 = arith.addf %119, %120 : vector<8x32xf32>
    %123 = arith.mulf %121, %122 : vector<8x32xf32>
    %124 = vector.extract_strided_slice %8 {offsets = [40, 0], sizes = [8, 160], strides = [1, 1]} : vector<64x160xf32> to vector<8x160xf32>
    %125 = tpu.concatenate %123, %118 in 1 : vector<8x32xf32>, vector<8x32xf32> -> vector<8x64xf32>
    %cst_21 = arith.constant dense<0.000000e+00> : vector<8x128xf32>
    %126 = tpu.matmul %125, %3, %cst_21 {dimension_numbers = #tpu.dot_dimension_numbers<[1], [0], [0], [1], [0, 0, 1, 1], [], []>} : vector<8x64xf32>, vector<64x128xf32>, vector<8x128xf32> -> vector<8x128xf32>
    %127 = vector.extract_strided_slice %124 {offsets = [0, 0], sizes = [8, 128], strides = [1, 1]} : vector<8x160xf32> to vector<8x128xf32>
    %128 = arith.addf %127, %126 : vector<8x128xf32>
    %129 = vector.extract_strided_slice %128 {offsets = [0, 0], sizes = [8, 96], strides = [1, 1]} : vector<8x128xf32> to vector<8x96xf32>
    %130 = arith.negf %129 : vector<8x96xf32>
    %131 = math.exp %130 : vector<8x96xf32>
    %cst_22 = arith.constant 1.000000e+00 : f32
    %132 = vector.broadcast %cst_22 : f32 to vector<8x96xf32>
    %133 = arith.addf %132, %131 : vector<8x96xf32>
    %134 = arith.divf %132, %133 : vector<8x96xf32>
    %135 = vector.extract_strided_slice %128 {offsets = [0, 96], sizes = [8, 32], strides = [1, 1]} : vector<8x128xf32> to vector<8x32xf32>
    %136 = math.tanh %135 : vector<8x32xf32>
    %137 = vector.extract_strided_slice %134 {offsets = [0, 32], sizes = [8, 32], strides = [1, 1]} : vector<8x96xf32> to vector<8x32xf32>
    %138 = arith.mulf %137, %118 : vector<8x32xf32>
    %139 = vector.extract_strided_slice %134 {offsets = [0, 0], sizes = [8, 32], strides = [1, 1]} : vector<8x96xf32> to vector<8x32xf32>
    %140 = arith.mulf %139, %136 : vector<8x32xf32>
    %141 = arith.addf %138, %140 : vector<8x32xf32>
    %142 = math.tanh %141 : vector<8x32xf32>
    %143 = vector.extract_strided_slice %124 {offsets = [0, 128], sizes = [8, 32], strides = [1, 1]} : vector<8x160xf32> to vector<8x32xf32>
    %144 = vector.extract_strided_slice %134 {offsets = [0, 64], sizes = [8, 32], strides = [1, 1]} : vector<8x96xf32> to vector<8x32xf32>
    %145 = arith.addf %142, %143 : vector<8x32xf32>
    %146 = arith.mulf %144, %145 : vector<8x32xf32>
    %147 = vector.extract_strided_slice %8 {offsets = [48, 0], sizes = [8, 160], strides = [1, 1]} : vector<64x160xf32> to vector<8x160xf32>
    %148 = tpu.concatenate %146, %141 in 1 : vector<8x32xf32>, vector<8x32xf32> -> vector<8x64xf32>
    %cst_23 = arith.constant dense<0.000000e+00> : vector<8x128xf32>
    %149 = tpu.matmul %148, %3, %cst_23 {dimension_numbers = #tpu.dot_dimension_numbers<[1], [0], [0], [1], [0, 0, 1, 1], [], []>} : vector<8x64xf32>, vector<64x128xf32>, vector<8x128xf32> -> vector<8x128xf32>
    %150 = vector.extract_strided_slice %147 {offsets = [0, 0], sizes = [8, 128], strides = [1, 1]} : vector<8x160xf32> to vector<8x128xf32>
    %151 = arith.addf %150, %149 : vector<8x128xf32>
    %152 = vector.extract_strided_slice %151 {offsets = [0, 0], sizes = [8, 96], strides = [1, 1]} : vector<8x128xf32> to vector<8x96xf32>
    %153 = arith.negf %152 : vector<8x96xf32>
    %154 = math.exp %153 : vector<8x96xf32>
    %cst_24 = arith.constant 1.000000e+00 : f32
    %155 = vector.broadcast %cst_24 : f32 to vector<8x96xf32>
    %156 = arith.addf %155, %154 : vector<8x96xf32>
    %157 = arith.divf %155, %156 : vector<8x96xf32>
    %158 = vector.extract_strided_slice %151 {offsets = [0, 96], sizes = [8, 32], strides = [1, 1]} : vector<8x128xf32> to vector<8x32xf32>
    %159 = math.tanh %158 : vector<8x32xf32>
    %160 = vector.extract_strided_slice %157 {offsets = [0, 32], sizes = [8, 32], strides = [1, 1]} : vector<8x96xf32> to vector<8x32xf32>
    %161 = arith.mulf %160, %141 : vector<8x32xf32>
    %162 = vector.extract_strided_slice %157 {offsets = [0, 0], sizes = [8, 32], strides = [1, 1]} : vector<8x96xf32> to vector<8x32xf32>
    %163 = arith.mulf %162, %159 : vector<8x32xf32>
    %164 = arith.addf %161, %163 : vector<8x32xf32>
    %165 = math.tanh %164 : vector<8x32xf32>
    %166 = vector.extract_strided_slice %147 {offsets = [0, 128], sizes = [8, 32], strides = [1, 1]} : vector<8x160xf32> to vector<8x32xf32>
    %167 = vector.extract_strided_slice %157 {offsets = [0, 64], sizes = [8, 32], strides = [1, 1]} : vector<8x96xf32> to vector<8x32xf32>
    %168 = arith.addf %165, %166 : vector<8x32xf32>
    %169 = arith.mulf %167, %168 : vector<8x32xf32>
    %170 = vector.extract_strided_slice %8 {offsets = [56, 0], sizes = [8, 160], strides = [1, 1]} : vector<64x160xf32> to vector<8x160xf32>
    %171 = tpu.concatenate %169, %164 in 1 : vector<8x32xf32>, vector<8x32xf32> -> vector<8x64xf32>
    %cst_25 = arith.constant dense<0.000000e+00> : vector<8x128xf32>
    %172 = tpu.matmul %171, %3, %cst_25 {dimension_numbers = #tpu.dot_dimension_numbers<[1], [0], [0], [1], [0, 0, 1, 1], [], []>} : vector<8x64xf32>, vector<64x128xf32>, vector<8x128xf32> -> vector<8x128xf32>
    %173 = vector.extract_strided_slice %170 {offsets = [0, 0], sizes = [8, 128], strides = [1, 1]} : vector<8x160xf32> to vector<8x128xf32>
    %174 = arith.addf %173, %172 : vector<8x128xf32>
    %175 = vector.extract_strided_slice %174 {offsets = [0, 0], sizes = [8, 96], strides = [1, 1]} : vector<8x128xf32> to vector<8x96xf32>
    %176 = arith.negf %175 : vector<8x96xf32>
    %177 = math.exp %176 : vector<8x96xf32>
    %cst_26 = arith.constant 1.000000e+00 : f32
    %178 = vector.broadcast %cst_26 : f32 to vector<8x96xf32>
    %179 = arith.addf %178, %177 : vector<8x96xf32>
    %180 = arith.divf %178, %179 : vector<8x96xf32>
    %181 = vector.extract_strided_slice %174 {offsets = [0, 96], sizes = [8, 32], strides = [1, 1]} : vector<8x128xf32> to vector<8x32xf32>
    %182 = math.tanh %181 : vector<8x32xf32>
    %183 = vector.extract_strided_slice %180 {offsets = [0, 32], sizes = [8, 32], strides = [1, 1]} : vector<8x96xf32> to vector<8x32xf32>
    %184 = arith.mulf %183, %164 : vector<8x32xf32>
    %185 = vector.extract_strided_slice %180 {offsets = [0, 0], sizes = [8, 32], strides = [1, 1]} : vector<8x96xf32> to vector<8x32xf32>
    %186 = arith.mulf %185, %182 : vector<8x32xf32>
    %187 = arith.addf %184, %186 : vector<8x32xf32>
    %188 = math.tanh %187 : vector<8x32xf32>
    %189 = vector.extract_strided_slice %170 {offsets = [0, 128], sizes = [8, 32], strides = [1, 1]} : vector<8x160xf32> to vector<8x32xf32>
    %190 = vector.extract_strided_slice %180 {offsets = [0, 64], sizes = [8, 32], strides = [1, 1]} : vector<8x96xf32> to vector<8x32xf32>
    %191 = arith.addf %188, %189 : vector<8x32xf32>
    %192 = arith.mulf %190, %191 : vector<8x32xf32>
    %193 = tpu.concatenate %31, %54, %77, %100, %123, %146, %169, %192 in 0 : vector<8x32xf32>, vector<8x32xf32>, vector<8x32xf32>, vector<8x32xf32>, vector<8x32xf32>, vector<8x32xf32>, vector<8x32xf32>, vector<8x32xf32> -> vector<64x32xf32>
    %c0_27 = arith.constant 0 : index
    %c0_28 = arith.constant 0 : index
    %194 = vector.load %arg8[%c0_27, %c0_28] : memref<64x128xf32, #tpu.memory_space<vmem>>, vector<64x128xf32>
    %c0_29 = arith.constant 0 : index
    %c0_30 = arith.constant 0 : index
    %195 = vector.load %arg6[%c0_29, %c0_30] : memref<32x128xf32, #tpu.memory_space<vmem>>, vector<32x128xf32>
    %cst_31 = arith.constant dense<0.000000e+00> : vector<64x128xf32>
    %196 = tpu.matmul %193, %195, %cst_31 {dimension_numbers = #tpu.dot_dimension_numbers<[1], [0], [0], [1], [0, 0, 1, 1], [], []>} : vector<64x32xf32>, vector<32x128xf32>, vector<64x128xf32> -> vector<64x128xf32>
    %c0_32 = arith.constant 0 : index
    %c0_33 = arith.constant 0 : index
    %197 = vector.load %arg7[%c0_32, %c0_33] : memref<1x128xf32, #tpu.memory_space<vmem>>, vector<1x128xf32>
    %198 = vector.broadcast %197 : vector<1x128xf32> to vector<64x128xf32>
    %199 = arith.addf %196, %198 : vector<64x128xf32>
    %200 = vector.extract_strided_slice %199 {offsets = [0, 0], sizes = [8, 128], strides = [1, 1]} : vector<64x128xf32> to vector<8x128xf32>
    %201 = tpu.concatenate %192, %187 in 1 : vector<8x32xf32>, vector<8x32xf32> -> vector<8x64xf32>
    %cst_34 = arith.constant dense<0.000000e+00> : vector<8x128xf32>
    %202 = tpu.matmul %201, %194, %cst_34 {dimension_numbers = #tpu.dot_dimension_numbers<[1], [0], [0], [1], [0, 0, 1, 1], [], []>} : vector<8x64xf32>, vector<64x128xf32>, vector<8x128xf32> -> vector<8x128xf32>
    %203 = arith.addf %200, %202 : vector<8x128xf32>
    %204 = vector.extract_strided_slice %203 {offsets = [0, 0], sizes = [8, 96], strides = [1, 1]} : vector<8x128xf32> to vector<8x96xf32>
    %205 = arith.negf %204 : vector<8x96xf32>
    %206 = math.exp %205 : vector<8x96xf32>
    %cst_35 = arith.constant 1.000000e+00 : f32
    %207 = vector.broadcast %cst_35 : f32 to vector<8x96xf32>
    %208 = arith.addf %207, %206 : vector<8x96xf32>
    %209 = arith.divf %207, %208 : vector<8x96xf32>
    %210 = vector.extract_strided_slice %203 {offsets = [0, 96], sizes = [8, 32], strides = [1, 1]} : vector<8x128xf32> to vector<8x32xf32>
    %211 = math.tanh %210 : vector<8x32xf32>
    %212 = vector.extract_strided_slice %209 {offsets = [0, 32], sizes = [8, 32], strides = [1, 1]} : vector<8x96xf32> to vector<8x32xf32>
    %213 = arith.mulf %212, %187 : vector<8x32xf32>
    %214 = vector.extract_strided_slice %209 {offsets = [0, 0], sizes = [8, 32], strides = [1, 1]} : vector<8x96xf32> to vector<8x32xf32>
    %215 = arith.mulf %214, %211 : vector<8x32xf32>
    %216 = arith.addf %213, %215 : vector<8x32xf32>
    %217 = math.tanh %216 : vector<8x32xf32>
    %218 = vector.extract_strided_slice %193 {offsets = [0, 0], sizes = [8, 32], strides = [1, 1]} : vector<64x32xf32> to vector<8x32xf32>
    %219 = vector.extract_strided_slice %209 {offsets = [0, 64], sizes = [8, 32], strides = [1, 1]} : vector<8x96xf32> to vector<8x32xf32>
    %220 = arith.addf %217, %218 : vector<8x32xf32>
    %221 = arith.mulf %219, %220 : vector<8x32xf32>
    %222 = vector.extract_strided_slice %199 {offsets = [8, 0], sizes = [8, 128], strides = [1, 1]} : vector<64x128xf32> to vector<8x128xf32>
    %223 = tpu.concatenate %221, %216 in 1 : vector<8x32xf32>, vector<8x32xf32> -> vector<8x64xf32>
    %cst_36 = arith.constant dense<0.000000e+00> : vector<8x128xf32>
    %224 = tpu.matmul %223, %194, %cst_36 {dimension_numbers = #tpu.dot_dimension_numbers<[1], [0], [0], [1], [0, 0, 1, 1], [], []>} : vector<8x64xf32>, vector<64x128xf32>, vector<8x128xf32> -> vector<8x128xf32>
    %225 = arith.addf %222, %224 : vector<8x128xf32>
    %226 = vector.extract_strided_slice %225 {offsets = [0, 0], sizes = [8, 96], strides = [1, 1]} : vector<8x128xf32> to vector<8x96xf32>
    %227 = arith.negf %226 : vector<8x96xf32>
    %228 = math.exp %227 : vector<8x96xf32>
    %cst_37 = arith.constant 1.000000e+00 : f32
    %229 = vector.broadcast %cst_37 : f32 to vector<8x96xf32>
    %230 = arith.addf %229, %228 : vector<8x96xf32>
    %231 = arith.divf %229, %230 : vector<8x96xf32>
    %232 = vector.extract_strided_slice %225 {offsets = [0, 96], sizes = [8, 32], strides = [1, 1]} : vector<8x128xf32> to vector<8x32xf32>
    %233 = math.tanh %232 : vector<8x32xf32>
    %234 = vector.extract_strided_slice %231 {offsets = [0, 32], sizes = [8, 32], strides = [1, 1]} : vector<8x96xf32> to vector<8x32xf32>
    %235 = arith.mulf %234, %216 : vector<8x32xf32>
    %236 = vector.extract_strided_slice %231 {offsets = [0, 0], sizes = [8, 32], strides = [1, 1]} : vector<8x96xf32> to vector<8x32xf32>
    %237 = arith.mulf %236, %233 : vector<8x32xf32>
    %238 = arith.addf %235, %237 : vector<8x32xf32>
    %239 = math.tanh %238 : vector<8x32xf32>
    %240 = vector.extract_strided_slice %193 {offsets = [8, 0], sizes = [8, 32], strides = [1, 1]} : vector<64x32xf32> to vector<8x32xf32>
    %241 = vector.extract_strided_slice %231 {offsets = [0, 64], sizes = [8, 32], strides = [1, 1]} : vector<8x96xf32> to vector<8x32xf32>
    %242 = arith.addf %239, %240 : vector<8x32xf32>
    %243 = arith.mulf %241, %242 : vector<8x32xf32>
    %244 = vector.extract_strided_slice %199 {offsets = [16, 0], sizes = [8, 128], strides = [1, 1]} : vector<64x128xf32> to vector<8x128xf32>
    %245 = tpu.concatenate %243, %238 in 1 : vector<8x32xf32>, vector<8x32xf32> -> vector<8x64xf32>
    %cst_38 = arith.constant dense<0.000000e+00> : vector<8x128xf32>
    %246 = tpu.matmul %245, %194, %cst_38 {dimension_numbers = #tpu.dot_dimension_numbers<[1], [0], [0], [1], [0, 0, 1, 1], [], []>} : vector<8x64xf32>, vector<64x128xf32>, vector<8x128xf32> -> vector<8x128xf32>
    %247 = arith.addf %244, %246 : vector<8x128xf32>
    %248 = vector.extract_strided_slice %247 {offsets = [0, 0], sizes = [8, 96], strides = [1, 1]} : vector<8x128xf32> to vector<8x96xf32>
    %249 = arith.negf %248 : vector<8x96xf32>
    %250 = math.exp %249 : vector<8x96xf32>
    %cst_39 = arith.constant 1.000000e+00 : f32
    %251 = vector.broadcast %cst_39 : f32 to vector<8x96xf32>
    %252 = arith.addf %251, %250 : vector<8x96xf32>
    %253 = arith.divf %251, %252 : vector<8x96xf32>
    %254 = vector.extract_strided_slice %247 {offsets = [0, 96], sizes = [8, 32], strides = [1, 1]} : vector<8x128xf32> to vector<8x32xf32>
    %255 = math.tanh %254 : vector<8x32xf32>
    %256 = vector.extract_strided_slice %253 {offsets = [0, 32], sizes = [8, 32], strides = [1, 1]} : vector<8x96xf32> to vector<8x32xf32>
    %257 = arith.mulf %256, %238 : vector<8x32xf32>
    %258 = vector.extract_strided_slice %253 {offsets = [0, 0], sizes = [8, 32], strides = [1, 1]} : vector<8x96xf32> to vector<8x32xf32>
    %259 = arith.mulf %258, %255 : vector<8x32xf32>
    %260 = arith.addf %257, %259 : vector<8x32xf32>
    %261 = math.tanh %260 : vector<8x32xf32>
    %262 = vector.extract_strided_slice %193 {offsets = [16, 0], sizes = [8, 32], strides = [1, 1]} : vector<64x32xf32> to vector<8x32xf32>
    %263 = vector.extract_strided_slice %253 {offsets = [0, 64], sizes = [8, 32], strides = [1, 1]} : vector<8x96xf32> to vector<8x32xf32>
    %264 = arith.addf %261, %262 : vector<8x32xf32>
    %265 = arith.mulf %263, %264 : vector<8x32xf32>
    %266 = vector.extract_strided_slice %199 {offsets = [24, 0], sizes = [8, 128], strides = [1, 1]} : vector<64x128xf32> to vector<8x128xf32>
    %267 = tpu.concatenate %265, %260 in 1 : vector<8x32xf32>, vector<8x32xf32> -> vector<8x64xf32>
    %cst_40 = arith.constant dense<0.000000e+00> : vector<8x128xf32>
    %268 = tpu.matmul %267, %194, %cst_40 {dimension_numbers = #tpu.dot_dimension_numbers<[1], [0], [0], [1], [0, 0, 1, 1], [], []>} : vector<8x64xf32>, vector<64x128xf32>, vector<8x128xf32> -> vector<8x128xf32>
    %269 = arith.addf %266, %268 : vector<8x128xf32>
    %270 = vector.extract_strided_slice %269 {offsets = [0, 0], sizes = [8, 96], strides = [1, 1]} : vector<8x128xf32> to vector<8x96xf32>
    %271 = arith.negf %270 : vector<8x96xf32>
    %272 = math.exp %271 : vector<8x96xf32>
    %cst_41 = arith.constant 1.000000e+00 : f32
    %273 = vector.broadcast %cst_41 : f32 to vector<8x96xf32>
    %274 = arith.addf %273, %272 : vector<8x96xf32>
    %275 = arith.divf %273, %274 : vector<8x96xf32>
    %276 = vector.extract_strided_slice %269 {offsets = [0, 96], sizes = [8, 32], strides = [1, 1]} : vector<8x128xf32> to vector<8x32xf32>
    %277 = math.tanh %276 : vector<8x32xf32>
    %278 = vector.extract_strided_slice %275 {offsets = [0, 32], sizes = [8, 32], strides = [1, 1]} : vector<8x96xf32> to vector<8x32xf32>
    %279 = arith.mulf %278, %260 : vector<8x32xf32>
    %280 = vector.extract_strided_slice %275 {offsets = [0, 0], sizes = [8, 32], strides = [1, 1]} : vector<8x96xf32> to vector<8x32xf32>
    %281 = arith.mulf %280, %277 : vector<8x32xf32>
    %282 = arith.addf %279, %281 : vector<8x32xf32>
    %283 = math.tanh %282 : vector<8x32xf32>
    %284 = vector.extract_strided_slice %193 {offsets = [24, 0], sizes = [8, 32], strides = [1, 1]} : vector<64x32xf32> to vector<8x32xf32>
    %285 = vector.extract_strided_slice %275 {offsets = [0, 64], sizes = [8, 32], strides = [1, 1]} : vector<8x96xf32> to vector<8x32xf32>
    %286 = arith.addf %283, %284 : vector<8x32xf32>
    %287 = arith.mulf %285, %286 : vector<8x32xf32>
    %288 = vector.extract_strided_slice %199 {offsets = [32, 0], sizes = [8, 128], strides = [1, 1]} : vector<64x128xf32> to vector<8x128xf32>
    %289 = tpu.concatenate %287, %282 in 1 : vector<8x32xf32>, vector<8x32xf32> -> vector<8x64xf32>
    %cst_42 = arith.constant dense<0.000000e+00> : vector<8x128xf32>
    %290 = tpu.matmul %289, %194, %cst_42 {dimension_numbers = #tpu.dot_dimension_numbers<[1], [0], [0], [1], [0, 0, 1, 1], [], []>} : vector<8x64xf32>, vector<64x128xf32>, vector<8x128xf32> -> vector<8x128xf32>
    %291 = arith.addf %288, %290 : vector<8x128xf32>
    %292 = vector.extract_strided_slice %291 {offsets = [0, 0], sizes = [8, 96], strides = [1, 1]} : vector<8x128xf32> to vector<8x96xf32>
    %293 = arith.negf %292 : vector<8x96xf32>
    %294 = math.exp %293 : vector<8x96xf32>
    %cst_43 = arith.constant 1.000000e+00 : f32
    %295 = vector.broadcast %cst_43 : f32 to vector<8x96xf32>
    %296 = arith.addf %295, %294 : vector<8x96xf32>
    %297 = arith.divf %295, %296 : vector<8x96xf32>
    %298 = vector.extract_strided_slice %291 {offsets = [0, 96], sizes = [8, 32], strides = [1, 1]} : vector<8x128xf32> to vector<8x32xf32>
    %299 = math.tanh %298 : vector<8x32xf32>
    %300 = vector.extract_strided_slice %297 {offsets = [0, 32], sizes = [8, 32], strides = [1, 1]} : vector<8x96xf32> to vector<8x32xf32>
    %301 = arith.mulf %300, %282 : vector<8x32xf32>
    %302 = vector.extract_strided_slice %297 {offsets = [0, 0], sizes = [8, 32], strides = [1, 1]} : vector<8x96xf32> to vector<8x32xf32>
    %303 = arith.mulf %302, %299 : vector<8x32xf32>
    %304 = arith.addf %301, %303 : vector<8x32xf32>
    %305 = math.tanh %304 : vector<8x32xf32>
    %306 = vector.extract_strided_slice %193 {offsets = [32, 0], sizes = [8, 32], strides = [1, 1]} : vector<64x32xf32> to vector<8x32xf32>
    %307 = vector.extract_strided_slice %297 {offsets = [0, 64], sizes = [8, 32], strides = [1, 1]} : vector<8x96xf32> to vector<8x32xf32>
    %308 = arith.addf %305, %306 : vector<8x32xf32>
    %309 = arith.mulf %307, %308 : vector<8x32xf32>
    %310 = vector.extract_strided_slice %199 {offsets = [40, 0], sizes = [8, 128], strides = [1, 1]} : vector<64x128xf32> to vector<8x128xf32>
    %311 = tpu.concatenate %309, %304 in 1 : vector<8x32xf32>, vector<8x32xf32> -> vector<8x64xf32>
    %cst_44 = arith.constant dense<0.000000e+00> : vector<8x128xf32>
    %312 = tpu.matmul %311, %194, %cst_44 {dimension_numbers = #tpu.dot_dimension_numbers<[1], [0], [0], [1], [0, 0, 1, 1], [], []>} : vector<8x64xf32>, vector<64x128xf32>, vector<8x128xf32> -> vector<8x128xf32>
    %313 = arith.addf %310, %312 : vector<8x128xf32>
    %314 = vector.extract_strided_slice %313 {offsets = [0, 0], sizes = [8, 96], strides = [1, 1]} : vector<8x128xf32> to vector<8x96xf32>
    %315 = arith.negf %314 : vector<8x96xf32>
    %316 = math.exp %315 : vector<8x96xf32>
    %cst_45 = arith.constant 1.000000e+00 : f32
    %317 = vector.broadcast %cst_45 : f32 to vector<8x96xf32>
    %318 = arith.addf %317, %316 : vector<8x96xf32>
    %319 = arith.divf %317, %318 : vector<8x96xf32>
    %320 = vector.extract_strided_slice %313 {offsets = [0, 96], sizes = [8, 32], strides = [1, 1]} : vector<8x128xf32> to vector<8x32xf32>
    %321 = math.tanh %320 : vector<8x32xf32>
    %322 = vector.extract_strided_slice %319 {offsets = [0, 32], sizes = [8, 32], strides = [1, 1]} : vector<8x96xf32> to vector<8x32xf32>
    %323 = arith.mulf %322, %304 : vector<8x32xf32>
    %324 = vector.extract_strided_slice %319 {offsets = [0, 0], sizes = [8, 32], strides = [1, 1]} : vector<8x96xf32> to vector<8x32xf32>
    %325 = arith.mulf %324, %321 : vector<8x32xf32>
    %326 = arith.addf %323, %325 : vector<8x32xf32>
    %327 = math.tanh %326 : vector<8x32xf32>
    %328 = vector.extract_strided_slice %193 {offsets = [40, 0], sizes = [8, 32], strides = [1, 1]} : vector<64x32xf32> to vector<8x32xf32>
    %329 = vector.extract_strided_slice %319 {offsets = [0, 64], sizes = [8, 32], strides = [1, 1]} : vector<8x96xf32> to vector<8x32xf32>
    %330 = arith.addf %327, %328 : vector<8x32xf32>
    %331 = arith.mulf %329, %330 : vector<8x32xf32>
    %332 = vector.extract_strided_slice %199 {offsets = [48, 0], sizes = [8, 128], strides = [1, 1]} : vector<64x128xf32> to vector<8x128xf32>
    %333 = tpu.concatenate %331, %326 in 1 : vector<8x32xf32>, vector<8x32xf32> -> vector<8x64xf32>
    %cst_46 = arith.constant dense<0.000000e+00> : vector<8x128xf32>
    %334 = tpu.matmul %333, %194, %cst_46 {dimension_numbers = #tpu.dot_dimension_numbers<[1], [0], [0], [1], [0, 0, 1, 1], [], []>} : vector<8x64xf32>, vector<64x128xf32>, vector<8x128xf32> -> vector<8x128xf32>
    %335 = arith.addf %332, %334 : vector<8x128xf32>
    %336 = vector.extract_strided_slice %335 {offsets = [0, 0], sizes = [8, 96], strides = [1, 1]} : vector<8x128xf32> to vector<8x96xf32>
    %337 = arith.negf %336 : vector<8x96xf32>
    %338 = math.exp %337 : vector<8x96xf32>
    %cst_47 = arith.constant 1.000000e+00 : f32
    %339 = vector.broadcast %cst_47 : f32 to vector<8x96xf32>
    %340 = arith.addf %339, %338 : vector<8x96xf32>
    %341 = arith.divf %339, %340 : vector<8x96xf32>
    %342 = vector.extract_strided_slice %335 {offsets = [0, 96], sizes = [8, 32], strides = [1, 1]} : vector<8x128xf32> to vector<8x32xf32>
    %343 = math.tanh %342 : vector<8x32xf32>
    %344 = vector.extract_strided_slice %341 {offsets = [0, 32], sizes = [8, 32], strides = [1, 1]} : vector<8x96xf32> to vector<8x32xf32>
    %345 = arith.mulf %344, %326 : vector<8x32xf32>
    %346 = vector.extract_strided_slice %341 {offsets = [0, 0], sizes = [8, 32], strides = [1, 1]} : vector<8x96xf32> to vector<8x32xf32>
    %347 = arith.mulf %346, %343 : vector<8x32xf32>
    %348 = arith.addf %345, %347 : vector<8x32xf32>
    %349 = math.tanh %348 : vector<8x32xf32>
    %350 = vector.extract_strided_slice %193 {offsets = [48, 0], sizes = [8, 32], strides = [1, 1]} : vector<64x32xf32> to vector<8x32xf32>
    %351 = vector.extract_strided_slice %341 {offsets = [0, 64], sizes = [8, 32], strides = [1, 1]} : vector<8x96xf32> to vector<8x32xf32>
    %352 = arith.addf %349, %350 : vector<8x32xf32>
    %353 = arith.mulf %351, %352 : vector<8x32xf32>
    %354 = vector.extract_strided_slice %199 {offsets = [56, 0], sizes = [8, 128], strides = [1, 1]} : vector<64x128xf32> to vector<8x128xf32>
    %355 = tpu.concatenate %353, %348 in 1 : vector<8x32xf32>, vector<8x32xf32> -> vector<8x64xf32>
    %cst_48 = arith.constant dense<0.000000e+00> : vector<8x128xf32>
    %356 = tpu.matmul %355, %194, %cst_48 {dimension_numbers = #tpu.dot_dimension_numbers<[1], [0], [0], [1], [0, 0, 1, 1], [], []>} : vector<8x64xf32>, vector<64x128xf32>, vector<8x128xf32> -> vector<8x128xf32>
    %357 = arith.addf %354, %356 : vector<8x128xf32>
    %358 = vector.extract_strided_slice %357 {offsets = [0, 0], sizes = [8, 96], strides = [1, 1]} : vector<8x128xf32> to vector<8x96xf32>
    %359 = arith.negf %358 : vector<8x96xf32>
    %360 = math.exp %359 : vector<8x96xf32>
    %cst_49 = arith.constant 1.000000e+00 : f32
    %361 = vector.broadcast %cst_49 : f32 to vector<8x96xf32>
    %362 = arith.addf %361, %360 : vector<8x96xf32>
    %363 = arith.divf %361, %362 : vector<8x96xf32>
    %364 = vector.extract_strided_slice %357 {offsets = [0, 96], sizes = [8, 32], strides = [1, 1]} : vector<8x128xf32> to vector<8x32xf32>
    %365 = math.tanh %364 : vector<8x32xf32>
    %366 = vector.extract_strided_slice %363 {offsets = [0, 32], sizes = [8, 32], strides = [1, 1]} : vector<8x96xf32> to vector<8x32xf32>
    %367 = arith.mulf %366, %348 : vector<8x32xf32>
    %368 = vector.extract_strided_slice %363 {offsets = [0, 0], sizes = [8, 32], strides = [1, 1]} : vector<8x96xf32> to vector<8x32xf32>
    %369 = arith.mulf %368, %365 : vector<8x32xf32>
    %370 = arith.addf %367, %369 : vector<8x32xf32>
    %371 = math.tanh %370 : vector<8x32xf32>
    %372 = vector.extract_strided_slice %193 {offsets = [56, 0], sizes = [8, 32], strides = [1, 1]} : vector<64x32xf32> to vector<8x32xf32>
    %373 = vector.extract_strided_slice %363 {offsets = [0, 64], sizes = [8, 32], strides = [1, 1]} : vector<8x96xf32> to vector<8x32xf32>
    %374 = arith.addf %371, %372 : vector<8x32xf32>
    %375 = arith.mulf %373, %374 : vector<8x32xf32>
    %376 = tpu.concatenate %221, %243, %265, %287, %309, %331, %353, %375 in 0 : vector<8x32xf32>, vector<8x32xf32>, vector<8x32xf32>, vector<8x32xf32>, vector<8x32xf32>, vector<8x32xf32>, vector<8x32xf32>, vector<8x32xf32> -> vector<64x32xf32>
    %c0_50 = arith.constant 0 : index
    %c0_51 = arith.constant 0 : index
    %377 = vector.load %arg12[%c0_50, %c0_51] : memref<8x32xf32, #tpu.memory_space<vmem>>, vector<8x32xf32>
    tpu.vector_store %arg12[%c0_50, %c0_51], %375 {strides = array<i32>} : memref<8x32xf32, #tpu.memory_space<vmem>>, vector<8x32xf32>,
    %c0_52 = arith.constant 0 : index
    %c0_53 = arith.constant 0 : index
    %378 = vector.load %arg13[%c0_52, %c0_53] : memref<8x32xf32, #tpu.memory_space<vmem>>, vector<8x32xf32>
    tpu.vector_store %arg13[%c0_52, %c0_53], %370 {strides = array<i32>} : memref<8x32xf32, #tpu.memory_space<vmem>>, vector<8x32xf32>,
    %c0_54 = arith.constant 0 : index
    %c0_55 = arith.constant 0 : index
    %379 = vector.load %arg9[%c0_54, %c0_55] : memref<32x10xf32, #tpu.memory_space<vmem>>, vector<32x10xf32>
    %cst_56 = arith.constant dense<0.000000e+00> : vector<64x10xf32>
    %380 = tpu.matmul %376, %379, %cst_56 {dimension_numbers = #tpu.dot_dimension_numbers<[1], [0], [0], [1], [0, 0, 1, 1], [], []>} : vector<64x32xf32>, vector<32x10xf32>, vector<64x10xf32> -> vector<64x10xf32>
    %c0_57 = arith.constant 0 : index
    %c0_58 = arith.constant 0 : index
    %381 = vector.load %arg10[%c0_57, %c0_58] : memref<1x10xf32, #tpu.memory_space<vmem>>, vector<1x10xf32>
    %382 = vector.broadcast %381 : vector<1x10xf32> to vector<64x10xf32>
    %383 = arith.addf %380, %382 : vector<64x10xf32>
    %c0_59 = arith.constant 0 : index
    %c0_60 = arith.constant 0 : index
    %384 = vector.load %arg11[%c0_59, %c0_60] : memref<64x10xf32, #tpu.memory_space<vmem>>, vector<64x10xf32>
    tpu.vector_store %arg11[%c0_59, %c0_60], %383 {strides = array<i32>} : memref<64x10xf32, #tpu.memory_space<vmem>>, vector<64x10xf32>,
    return
  }
}

</mosaic_0001>

<bundles_post_ra>
// kernel: tpu_custom_call.1
= control target key start
LH: loop header
LB: loop body
LE: loop exit
PB: predicated region body
PF: predicated region fallthrough
CT: control target
= control target key end

     0   :  { %19 = vsyncpa [#allocation3], 0  ;;  %s2471_s0 = inlined_call_operand.vmem [shape: f32[64,16], index: 0, kind: input, shape index: {}]   ;;  %s2472_s1 = inlined_call_operand.vmem [shape: f32[8,32], index: 1, kind: input, shape index: {}]   ;;  %s2473_s2 = inlined_call_operand.vmem [shape: f32[8,32], index: 2, kind: input, shape index: {}]   ;;  %s2474_s3 = inlined_call_operand.vmem [shape: f32[16,160], index: 3, kind: input, shape index: {}]   ;;  %s2475_s4 = inlined_call_operand.vmem [shape: f32[1,160], index: 4, kind: input, shape index: {}]   ;;  %s2476_s5 = inlined_call_operand.vmem [shape: f32[64,128], index: 5, kind: input, shape index: {}]   ;;  %s2477_s6 = inlined_call_operand.hbm [shape: f32[32,128], index: 6, kind: input, shape index: {}]   ;;  %s2478_s7 = inlined_call_operand.vmem [shape: f32[1,128], index: 7, kind: input, shape index: {}]   ;;  %s2479_s8 = inlined_call_operand.hbm [shape: f32[64,128], index: 8, kind: input, shape index: {}]   ;;  %s2480_s9 = inlined_call_operand.vmem [shape: f32[32,10], index: 9, kind: input, shape index: {}]   ;;  %s2481_s10 = inlined_call_operand.vmem [shape: f32[1,10], index: 10, kind: input, shape index: {}]   ;;  %s2482_s11 = inlined_call_operand.vmem [shape: f32[64,10], index: 11, kind: output, shape index: {0}]   ;;  %s2483_s12 = inlined_call_operand.hbm [shape: f32[8,32], index: 12, kind: output, shape index: {1}]   ;;  %s2484_s13 = inlined_call_operand.hbm [shape: f32[8,32], index: 13, kind: output, shape index: {2}]  }
   0x1   :  { %20 = vsyncpa [#allocation6], 0 }
   0x2   :  { %21 = vsyncpa [#allocation4], 0 }
   0x3   :  { %22 = vsyncpa [#allocation9], 0  ;;  %s39_s27 = sshll.u32 %s2477_s6, 4  ;;  %s1850_s28 = smov [#allocation2]   ;;  %s40_s27 = int_to_ptr.hbm [resolvable:$true] %s39_s27 }
   0x4   :  { %s41_s29 = sshll.u32 %s1850_s28, 4  ;;  %s54_s15 = sshll.u32 %s2479_s8, 4  ;;  %s42_s29 = int_to_ptr.vmem [resolvable:$true] %s41_s29  ;;  %s55_s15 = int_to_ptr.hbm [resolvable:$true] %s54_s15 }
   0x5   :  { %s1851_s16 = smov 128   ;;  %s1852_s17 = smov 8  }
   0x6   :  { %47 = dma.hbm_to_vmem [thread:$0]  %s40_s27, 512, %s42_s29, [#allocation3], %s1851_s16, %s1851_s16, %s1852_s17  }
   0x7   :  { %s1853_s18 = smov [#allocation5]  }
   0x8   :  { %s56_s19 = sshll.u32 %s1853_s18, 4  ;;  %s57_s19 = int_to_ptr.vmem [resolvable:$true] %s56_s19 }
   0x9   :  { %62 = dma.hbm_to_vmem [thread:$0]  %s55_s15, 1024, %s57_s19, [#allocation6], %s1851_s16, %s1851_s16, %s1852_s17  }
   0xa   :  { %1842 = dma.done.wait [#allocation3], 512  }
   0xb   :  { %1843 = vsyncadd [#allocation3], 4294966784 }
   0xc   :  { %1844 = dma.done.wait [#allocation6], 1024  }
   0xd   :  { %1845 = vsyncadd [#allocation6], 4294966272  ;;  %v76_v0 = vld [vmem:[%s2473_s2] sm:$0xff]  ;;  %v1941_v1 = vld [vmem:[%s2476_s5 + $0x38] sm:$0xff]  ;;  %s1854_s24 = smov 32   ;;  %vm103_vm0 = vcmask 130048  }
   0xe   :  { %v1946_v2 = vld [vmem:[%s2476_s5 + $0x30] sm:$0xff]  ;;  %211 = vrot.lane.b32.xlu0 %v76_v0, %s1854_s24  ;;  %228 = vmatpush.msra.mxu2 %v1941_v1  ;;  %v1953_v3 = vld [vmem:[%s2476_s5 + $0x28] sm:$0xff]  ;;  %v1960_v4 = vld [vmem:[%s2476_s5 + $0x20] sm:$0xff]  ;;  %vm214_vm1 = vcmask 261120   ;;  %vm216_vm2 = vcmask 523264   ;;  %s1855_s6 = smov 64  }
   0xf   :  { %299 = vmatpush.msra.mxu3 %v1941_v1  ;;  %v1967_v5 = vld [vmem:[%s2476_s5 + $0x18] sm:$0xff]  ;;  %v1974_v6 = vld [vmem:[%s2476_s5 + $0x10] sm:$0xff]  ;;  %v1981_v7 = vld [vmem:[%s2476_s5 + $0x8] sm:$0xff]  ;;  %s1857_s23 = smov [#allocation7]   ;;  %s1506_s25 = sshll.u32 %s2483_s12, 4  ;;  %s1507_s25 = int_to_ptr.hbm [resolvable:$true] %s1506_s25 }
  0x10   :  { %229 = vmatpush.msra.mxu2 %v1946_v2  ;;  %v1991_v8 = vld [vmem:[%s2476_s5] sm:$0xff]  ;;  %v95_v9 = vld [vmem:[%s2474_s3 + $0x10] sm:$0xff]  ;;  %v96_v15 = vld [vmem:[%s2474_s3 + $0x18] sm:$0xff] }
  0x11   :  { %300 = vmatpush.msra.mxu3 %v1946_v2  ;;  %v93_v10 = vld [vmem:[%s2474_s3] sm:$0xff]  ;;  %142 = vmatpush.msra.mxu0 %v95_v9  ;;  %v94_v16 = vld [vmem:[%s2474_s3 + $0x8] sm:$0xff]  ;;  %v79_v49 = vld [vmem:[%s2471_s0 + $0x10] sm:$0xff] }
  0x12   :  { %230 = vmatpush.msra.mxu2 %v1953_v3  ;;  %v77_v11 = vld [vmem:[%s2471_s0] sm:$0xff]  ;;  %183 = vmatpush.msra.mxu1 %v96_v15  ;;  %v78_v48 = vld [vmem:[%s2471_s0 + $0x8] sm:$0xff]  ;;  %v80_v50 = vld [vmem:[%s2471_s0 + $0x18] sm:$0xff] }
  0x13   :  { %301 = vmatpush.msra.mxu3 %v1953_v3  ;;  %143 = vmatpush.msra.mxu0 %v93_v10  ;;  %v75_v12 = vld [vmem:[%s2472_s1] sm:$0xff]  ;;  %v791_v51 = vld [vmem:[#allocation2 + $0x18] sm:$0xff]  ;;  %v790_v52 = vld [vmem:[#allocation2 + $0x10] sm:$0xff] }
  0x14   :  { %231 = vmatpush.msra.mxu2 %v1960_v4  ;;  %1535 = vmatmul.msk.f32.vlgmr.msra.gmra.mxu0 %vm103_vm0, %v77_v11  ;;  %v97_v17 = vld [vmem:[%s2475_s4] sm:$0x3]  ;;  %v789_v53 = vld [vmem:[#allocation2 + $0x8] sm:$0xff]  ;;  %v83_v59 = vld [vmem:[%s2471_s0 + $0x30] sm:$0xff] }
  0x15   :  { %302 = vmatpush.msra.mxu3 %v1960_v4  ;;  %184 = vmatpush.msra.mxu1 %v94_v16  ;;  %v2044_v18 = vperm.slane %v97_v17, 0  ;;  %v2049_v39 = vperm.slane %v97_v17, 1  ;;  %v788_v54 = vld [vmem:[#allocation2] sm:$0xff]  ;;  %v82_v58 = vld [vmem:[%s2471_s0 + $0x28] sm:$0xff]  ;;  %v84_v60 = vld [vmem:[%s2471_s0 + $0x38] sm:$0xff] }
  0x16   :  { %232 = vmatpush.msra.mxu2 %v1967_v5  ;;  %1543 = vmatmul.msk.f32.vlgmr.msra.gmra.mxu1 %vm103_vm0, %v77_v11  ;;  %v81_v55 = vld [vmem:[%s2471_s0 + $0x20] sm:$0xff]  ;;  %s1856_s0 = smov 96  }
  0x17   :  { %303 = vmatpush.msra.mxu3 %v1967_v5  ;;  %827 = vmatpush.msrb.mxu0 %v791_v51 }
  0x18   :  { %233 = vmatpush.msra.mxu2 %v1974_v6 }
  0x19   :  { %304 = vmatpush.msra.mxu3 %v1974_v6  ;;  %828 = vmatpush.msrb.mxu0 %v790_v52 }
  0x1a   :  { %234 = vmatpush.msra.mxu2 %v1981_v7 }
  0x1b   :  { %305 = vmatpush.msra.mxu3 %v1981_v7  ;;  %829 = vmatpush.msrb.mxu0 %v789_v53 }
  0x1c   :  { %235 = vmatpush.msra.mxu2 %v1991_v8  ;;  %1536 = vmatmul.msk.f32.gmra.mxu0 %vm103_vm0, %v78_v48 }
  0x1d   :  { %306 = vmatpush.msra.mxu3 %v1991_v8  ;;  %830 = vmatpush.msrb.mxu0 %v788_v54 }
  0x1e   :  { %370 = vmatpush.msrb.mxu2 %v1941_v1  ;;  %1544 = vmatmul.msk.f32.gmra.mxu1 %vm103_vm0, %v78_v48 }
  0x1f   :  { %441 = vmatpush.msrb.mxu3 %v1941_v1 }
  0x20   :  { %371 = vmatpush.msrb.mxu2 %v1946_v2 }
  0x21   :  { %442 = vmatpush.msrb.mxu3 %v1946_v2 }
  0x22   :  { %372 = vmatpush.msrb.mxu2 %v1953_v3 }
  0x23   :  { %443 = vmatpush.msrb.mxu3 %v1953_v3 }
  0x24   :  { %373 = vmatpush.msrb.mxu2 %v1960_v4  ;;  %1537 = vmatmul.msk.f32.gmra.mxu0 %vm103_vm0, %v79_v49 }
  0x25   :  { %444 = vmatpush.msrb.mxu3 %v1960_v4 }
  0x26   :  { %374 = vmatpush.msrb.mxu2 %v1967_v5  ;;  %1545 = vmatmul.msk.f32.gmra.mxu1 %vm103_vm0, %v79_v49 }
  0x27   :  { %445 = vmatpush.msrb.mxu3 %v1967_v5 }
  0x28   :  { %375 = vmatpush.msrb.mxu2 %v1974_v6 }
  0x29   :  { %446 = vmatpush.msrb.mxu3 %v1974_v6 }
  0x2a   :  { %376 = vmatpush.msrb.mxu2 %v1981_v7 }
  0x2b   :  { %447 = vmatpush.msrb.mxu3 %v1981_v7 }
  0x2c   :  { %377 = vmatpush.msrb.mxu2 %v1991_v8  ;;  %1538 = vmatmul.msk.f32.gmra.mxu0 %vm103_vm0, %v80_v50 }
  0x2d   :  { %448 = vmatpush.msrb.mxu3 %v1991_v8 }
  0x2e   :  { %1546 = vmatmul.msk.f32.gmra.mxu1 %vm103_vm0, %v80_v50 }
  0x34   :  { %1539 = vmatmul.msk.f32.gmra.mxu0 %vm103_vm0, %v81_v55 }
  0x36   :  { %1547 = vmatmul.msk.f32.gmra.mxu1 %vm103_vm0, %v81_v55 }
  0x3c   :  { %1540 = vmatmul.msk.f32.gmra.mxu0 %vm103_vm0, %v82_v58 }
  0x3e   :  { %1548 = vmatmul.msk.f32.gmra.mxu1 %vm103_vm0, %v82_v58 }
  0x44   :  { %1541 = vmatmul.msk.f32.gmra.mxu0 %vm103_vm0, %v83_v59 }
  0x46   :  { %1549 = vmatmul.msk.f32.gmra.mxu1 %vm103_vm0, %v83_v59 }
  0x4c   :  { %1542 = vmatmul.msk.f32.gmra.mxu0 %vm103_vm0, %v84_v60 }
  0x4e   :  { %1550 = vmatmul.msk.f32.gmra.mxu1 %vm103_vm0, %v84_v60 }
  0x80   :  { %v212_v13 = vpop.permute.xlu0 %211 }
  0x81   :  { %v215_v14 = vsel %vm214_vm1, %v75_v12, %v212_v13 }
  0x82   :  { %1551 = vmatmul.msk.f32.vlgmr.msra.gmra.mxu2 %vm216_vm2, %v215_v14 }
  0x83   :  { %512 = vmatpush.msra.mxu2 %v1941_v1 }
  0x85   :  { %513 = vmatpush.msra.mxu2 %v1946_v2 }
  0x87   :  { %514 = vmatpush.msra.mxu2 %v1953_v3 }
  0x89   :  { %515 = vmatpush.msra.mxu2 %v1960_v4 }
  0x8b   :  { %516 = vmatpush.msra.mxu2 %v1967_v5 }
  0x8d   :  { %517 = vmatpush.msra.mxu2 %v1974_v6 }
  0x8f   :  { %518 = vmatpush.msra.mxu2 %v1981_v7 }
  0x91   :  { %519 = vmatpush.msra.mxu2 %v1991_v8  ;;  %v145_v19 = vpop.f32.mrf.mxu0 }
  0x92   :  { %v146_v20 = vadd.f32 %v145_v19, %v2044_v18 }
  0x93   :  { %v186_v40 = vpop.f32.mrf.mxu1 }
  0x94   :  { %v187_v41 = vadd.f32 %v186_v40, %v2049_v39 }
  0x99   :  { %v148_v63 = vpop.f32.mrf.mxu0 }
  0x9a   :  { %v149_v0 = vadd.f32 %v148_v63, %v2044_v18 }
  0x9b   :  { %v189_v15 = vpop.f32.mrf.mxu1 }
  0x9c   :  { %v190_v16 = vadd.f32 %v189_v15, %v2049_v39 }
  0xa3   :  { %v192_v49 = vpop.f32.mrf.mxu1 }
  0xa4   :  { %v193_v50 = vadd.f32 %v192_v49, %v2049_v39 }
 0x105   :  { %v237_v21 = vpop.f32.mrf.mxu2 }
 0x106   :  { %v240_v22 = vadd.f32 %v237_v21, %v146_v20 }
 0x108   :  { %1618 = vtanh.f32 %v240_v22  ;;  %v1552_v24 = vmul.f32 -1.442695, %v240_v22 }
 0x10a   :  { %1620 = vpow2.f32 %v1552_v24 }
 0x10e   :  { %v1619_v23 = vpop.eup %1618 }
 0x10f   :  { %263 = vrot.lane.b32.xlu0 %v1619_v23, %s1854_s24 }
 0x110   :  { %v1621_v25 = vpop.eup %1620 }
 0x111   :  { %v244_v26 = vadd.f32 1.0, %v1621_v25 }
 0x113   :  { %1622 = vrcp.f32 %v244_v26  ;;  %v256_v32 = vand.u32 2147483648, %v244_v26  ;;  %vm250_vm4 = vweird.f32 %v244_v26  ;;  %v254_v33 = vand.u32 2147483647, %v244_v26 }
 0x115   :  { %v257_v35 = vor.u32 1.1754944e-38, %v256_v32  ;;  %vm255_vm6 = vcmp.eq.f32.partialorder %v254_v33, 8.507059e+37 }
 0x119   :  { %v1623_v27 = vpop.eup %1622 }
 0x11a   :  { %v246_v28 = vmul.f32 %v1623_v27, %v244_v26  ;;  %vm251_vm3 = vweird.f32 %v1623_v27 }
 0x11b   :  { %vm252_vm5 = vmor %vm250_vm4, %vm251_vm3 }
 0x11c   :  { %v247_v29 = vsub.f32 1.0, %v246_v28 }
 0x11e   :  { %v248_v30 = vmul.f32 %v1623_v27, %v247_v29 }
 0x120   :  { %v249_v31 = vadd.f32 %v1623_v27, %v248_v30 }
 0x122   :  { %v253_v34 = vsel %vm252_vm5, %v1623_v27, %v249_v31 }
 0x123   :  { %v258_v37 = vsel %vm255_vm6, %v257_v35, %v253_v34 }
 0x124   :  { %v261_v42 = vmul.f32 %v258_v37, %v212_v13 }
 0x181   :  { %v264_v36 = vpop.permute.xlu0 %263 }
 0x182   :  { %v266_v38 = vmul.f32 %v264_v36, %v258_v37 }
 0x184   :  { %268 = vrot.lane.b32.xlu1 %v266_v38, %s1854_s24 }
 0x18c   :  { %274 = vrot.lane.b32.xlu1 %v187_v41, %s1854_s24  ;;  %v151_v41 = vpop.f32.mrf.mxu0 }
 0x1f6   :  { %v269_v43 = vpop.permute.xlu1 %268 }
 0x1f7   :  { %v2053_v44 = vadd.f32 %v269_v43, %v261_v42  ;;  %v152_v42 = vadd.f32 %v151_v41, %v2044_v18 }
 0x1f9   :  { %1624 = vtanh.f32 %v2053_v44 }
 0x1fe   :  { %v275_v45 = vpop.permute.xlu1 %274 }
 0x1ff   :  { %v1625_v46 = vpop.eup %1624 }
 0x200   :  { %v277_v47 = vadd.f32 %v1625_v46, %v275_v45 }
 0x202   :  { %279 = vrot.lane.b32.xlu2 %v277_v47, %s1854_s24 }
 0x25c   :  { %v280_v56 = vpop.permute.xlu2 %279 }
 0x25d   :  { %v2077_v57 = vmul.f32 %v280_v56, %v258_v37 }
 0x25f   :  { %284 = vrot.lane.b32.xlu2 %v2077_v57, %s1855_s6 }
 0x267   :  { %345 = vrot.lane.b32.xlu2 %v190_v16, %s1854_s24 }
 0x2b9   :  { %v285_v61 = vpop.permute.xlu2 %284 }
 0x2ba   :  { %1567 = vmatmul.msk.f32.vlgmr.msrb.gmra.mxu0 %vm214_vm1, %v285_v61  ;;  %v287_v62 = vsel %vm214_vm1, %v285_v61, %v2053_v44 }
 0x2bb   :  { %1553 = vmatmul.msk.f32.vlgmr.msra.gmra.mxu3 %vm216_vm2, %v287_v62 }
 0x2bc   :  { %583 = vmatpush.msra.mxu3 %v1941_v1 }
 0x2be   :  { %584 = vmatpush.msra.mxu3 %v1946_v2 }
 0x2c0   :  { %585 = vmatpush.msra.mxu3 %v1953_v3 }
 0x2c1   :  { %v346_v33 = vpop.permute.xlu2 %345 }
 0x2c2   :  { %586 = vmatpush.msra.mxu3 %v1960_v4 }
 0x2c4   :  { %587 = vmatpush.msra.mxu3 %v1967_v5 }
 0x2c6   :  { %588 = vmatpush.msra.mxu3 %v1974_v6 }
 0x2c8   :  { %589 = vmatpush.msra.mxu3 %v1981_v7 }
 0x2ca   :  { %590 = vmatpush.msra.mxu3 %v1991_v8 }
 0x33e   :  { %v308_v9 = vpop.f32.mrf.mxu3 }
 0x33f   :  { %v311_v10 = vadd.f32 %v308_v9, %v149_v0 }
 0x341   :  { %1626 = vtanh.f32 %v311_v10  ;;  %v1554_v12 = vmul.f32 -1.442695, %v311_v10 }
 0x343   :  { %1628 = vpow2.f32 %v1554_v12 }
 0x347   :  { %v1627_v11 = vpop.eup %1626 }
 0x348   :  { %334 = vrot.lane.b32.xlu0 %v1627_v11, %s1854_s24 }
 0x349   :  { %v1629_v13 = vpop.eup %1628 }
 0x34a   :  { %v315_v14 = vadd.f32 1.0, %v1629_v13 }
 0x34c   :  { %1630 = vrcp.f32 %v315_v14  ;;  %v327_v23 = vand.u32 2147483648, %v315_v14  ;;  %vm321_vm8 = vweird.f32 %v315_v14  ;;  %v325_v24 = vand.u32 2147483647, %v315_v14 }
 0x34e   :  { %v328_v26 = vor.u32 1.1754944e-38, %v327_v23  ;;  %vm326_vm10 = vcmp.eq.f32.partialorder %v325_v24, 8.507059e+37 }
 0x352   :  { %v1631_v17 = vpop.eup %1630 }
 0x353   :  { %v317_v19 = vmul.f32 %v1631_v17, %v315_v14  ;;  %vm322_vm7 = vweird.f32 %v1631_v17 }
 0x354   :  { %vm323_vm9 = vmor %vm321_vm8, %vm322_vm7 }
 0x355   :  { %v318_v20 = vsub.f32 1.0, %v317_v19  ;;  %v195_v19 = vpop.f32.mrf.mxu1 }
 0x357   :  { %v319_v21 = vmul.f32 %v1631_v17, %v318_v20  ;;  %v196_v20 = vadd.f32 %v195_v19, %v2049_v39 }
 0x359   :  { %v320_v22 = vadd.f32 %v1631_v17, %v319_v21 }
 0x35b   :  { %v324_v25 = vsel %vm323_vm9, %v1631_v17, %v320_v22 }
 0x35c   :  { %v329_v28 = vsel %vm326_vm10, %v328_v26, %v324_v25 }
 0x35d   :  { %v332_v30 = vmul.f32 %v329_v28, %v2053_v44 }
 0x3ba   :  { %v335_v27 = vpop.permute.xlu0 %334 }
 0x3bb   :  { %v337_v29 = vmul.f32 %v335_v27, %v329_v28 }
 0x3bd   :  { %339 = vrot.lane.b32.xlu1 %v337_v29, %s1854_s24 }
 0x42f   :  { %v340_v31 = vpop.permute.xlu1 %339 }
 0x430   :  { %v342_v32 = vadd.f32 %v340_v31, %v332_v30 }
 0x432   :  { %1632 = vtanh.f32 %v342_v32 }
 0x438   :  { %v1633_v34 = vpop.eup %1632 }
 0x439   :  { %v348_v35 = vadd.f32 %v1633_v34, %v346_v33 }
 0x43b   :  { %350 = vrot.lane.b32.xlu0 %v348_v35, %s1854_s24 }
 0x4ad   :  { %v351_v36 = vpop.permute.xlu0 %350 }
 0x4ae   :  { %v2115_v37 = vmul.f32 %v351_v36, %v329_v28 }
 0x4b0   :  { %355 = vrot.lane.b32.xlu1 %v2115_v37, %s1855_s6 }
 0x4b8   :  { %416 = vrot.lane.b32.xlu1 %v193_v50, %s1854_s24 }
 0x522   :  { %v356_v38 = vpop.permute.xlu1 %355 }
 0x523   :  { %v358_v40 = vsel %vm214_vm1, %v356_v38, %v342_v32  ;;  %1568 = vmatmul.msk.f32.gmra.mxu0 %vm214_vm1, %v356_v38 }
 0x524   :  { %1555 = vmatmul.msk.f32.vlgmr.msrb.gmra.mxu2 %vm216_vm2, %v358_v40 }
 0x525   :  { %654 = vmatpush.msrb.mxu2 %v1941_v1 }
 0x527   :  { %655 = vmatpush.msrb.mxu2 %v1946_v2 }
 0x529   :  { %656 = vmatpush.msrb.mxu2 %v1953_v3 }
 0x52a   :  { %v417_v11 = vpop.permute.xlu1 %416 }
 0x52b   :  { %657 = vmatpush.msrb.mxu2 %v1960_v4 }
 0x52d   :  { %658 = vmatpush.msrb.mxu2 %v1967_v5 }
 0x52f   :  { %659 = vmatpush.msrb.mxu2 %v1974_v6 }
 0x531   :  { %660 = vmatpush.msrb.mxu2 %v1981_v7 }
 0x533   :  { %661 = vmatpush.msrb.mxu2 %v1991_v8 }
 0x5a7   :  { %v379_v43 = vpop.f32.mrf.mxu2 }
 0x5a8   :  { %v382_v44 = vadd.f32 %v379_v43, %v152_v42 }
 0x5aa   :  { %1634 = vtanh.f32 %v382_v44  ;;  %v1556_v46 = vmul.f32 -1.442695, %v382_v44 }
 0x5ac   :  { %1636 = vpow2.f32 %v1556_v46 }
 0x5b0   :  { %v1635_v45 = vpop.eup %1634 }
 0x5b1   :  { %405 = vrot.lane.b32.xlu2 %v1635_v45, %s1854_s24 }
 0x5b2   :  { %v1637_v47 = vpop.eup %1636 }
 0x5b3   :  { %v386_v48 = vadd.f32 1.0, %v1637_v47 }
 0x5b5   :  { %1638 = vrcp.f32 %v386_v48  ;;  %v398_v56 = vand.u32 2147483648, %v386_v48  ;;  %vm392_vm12 = vweird.f32 %v386_v48  ;;  %v396_v58 = vand.u32 2147483647, %v386_v48 }
 0x5b7   :  { %v399_v60 = vor.u32 1.1754944e-38, %v398_v56  ;;  %vm397_vm14 = vcmp.eq.f32.partialorder %v396_v58, 8.507059e+37 }
 0x5bb   :  { %v1639_v51 = vpop.eup %1638 }
 0x5bc   :  { %v388_v52 = vmul.f32 %v1639_v51, %v386_v48  ;;  %vm393_vm11 = vweird.f32 %v1639_v51 }
 0x5bd   :  { %vm394_vm13 = vmor %vm392_vm12, %vm393_vm11 }
 0x5be   :  { %v389_v53 = vsub.f32 1.0, %v388_v52 }
 0x5c0   :  { %v390_v54 = vmul.f32 %v1639_v51, %v389_v53  ;;  %v198_v53 = vpop.f32.mrf.mxu1 }
 0x5c2   :  { %v391_v55 = vadd.f32 %v1639_v51, %v390_v54  ;;  %v199_v54 = vadd.f32 %v198_v53, %v2049_v39 }
 0x5c4   :  { %v395_v59 = vsel %vm394_vm13, %v1639_v51, %v391_v55 }
 0x5c5   :  { %v400_v62 = vsel %vm397_vm14, %v399_v60, %v395_v59 }
 0x5c6   :  { %v403_v0 = vmul.f32 %v400_v62, %v342_v32 }
 0x60b   :  { %v406_v61 = vpop.permute.xlu2 %405 }
 0x60c   :  { %v408_v63 = vmul.f32 %v406_v61, %v400_v62 }
 0x60e   :  { %410 = vrot.lane.b32.xlu0 %v408_v63, %s1854_s24 }
 0x680   :  { %v411_v9 = vpop.permute.xlu0 %410 }
 0x681   :  { %v413_v10 = vadd.f32 %v411_v9, %v403_v0 }
 0x683   :  { %1640 = vtanh.f32 %v413_v10 }
 0x689   :  { %v1641_v12 = vpop.eup %1640 }
 0x68a   :  { %v419_v13 = vadd.f32 %v1641_v12, %v417_v11 }
 0x68c   :  { %421 = vrot.lane.b32.xlu2 %v419_v13, %s1854_s24 }
 0x6e6   :  { %v422_v14 = vpop.permute.xlu2 %421 }
 0x6e7   :  { %v2136_v15 = vmul.f32 %v422_v14, %v400_v62 }
 0x6e9   :  { %426 = vrot.lane.b32.xlu0 %v2136_v15, %s1855_s6 }
 0x6f1   :  { %487 = vrot.lane.b32.xlu0 %v196_v20, %s1854_s24 }
 0x75b   :  { %v427_v16 = vpop.permute.xlu0 %426 }
 0x75c   :  { %v429_v17 = vsel %vm214_vm1, %v427_v16, %v413_v10  ;;  %1569 = vmatmul.msk.f32.gmra.mxu0 %vm214_vm1, %v427_v16 }
 0x75d   :  { %1557 = vmatmul.msk.f32.vlgmr.msrb.gmra.mxu3 %vm216_vm2, %v429_v17 }
 0x75e   :  { %725 = vmatpush.msrb.mxu3 %v1941_v1  ;;  %v154_v1 = vpop.f32.mrf.mxu0 }
 0x760   :  { %726 = vmatpush.msrb.mxu3 %v1946_v2  ;;  %v155_v2 = vadd.f32 %v154_v1, %v2044_v18 }
 0x762   :  { %727 = vmatpush.msrb.mxu3 %v1953_v3 }
 0x763   :  { %v488_v36 = vpop.permute.xlu0 %487 }
 0x764   :  { %728 = vmatpush.msrb.mxu3 %v1960_v4 }
 0x766   :  { %729 = vmatpush.msrb.mxu3 %v1967_v5  ;;  %v157_v45 = vpop.f32.mrf.mxu0 }
 0x767   :  { %v158_v46 = vadd.f32 %v157_v45, %v2044_v18 }
 0x768   :  { %730 = vmatpush.msrb.mxu3 %v1974_v6 }
 0x76a   :  { %731 = vmatpush.msrb.mxu3 %v1981_v7 }
 0x76c   :  { %732 = vmatpush.msrb.mxu3 %v1991_v8 }
 0x7e0   :  { %v450_v21 = vpop.f32.mrf.mxu3 }
 0x7e1   :  { %v453_v3 = vadd.f32 %v450_v21, %v155_v2 }
 0x7e3   :  { %1642 = vtanh.f32 %v453_v3  ;;  %v1558_v5 = vmul.f32 -1.442695, %v453_v3  ;;  %v160_v3 = vpop.f32.mrf.mxu0 }
 0x7e5   :  { %1644 = vpow2.f32 %v1558_v5 }
 0x7e9   :  { %v1643_v4 = vpop.eup %1642 }
 0x7ea   :  { %476 = vrot.lane.b32.xlu1 %v1643_v4, %s1854_s24  ;;  %v161_v4 = vadd.f32 %v160_v3, %v2044_v18 }
 0x7eb   :  { %v1645_v6 = vpop.eup %1644  ;;  %v163_v53 = vpop.f32.mrf.mxu0 }
 0x7ec   :  { %v457_v7 = vadd.f32 1.0, %v1645_v6 }
 0x7ee   :  { %1646 = vrcp.f32 %v457_v7  ;;  %v469_v26 = vand.u32 2147483648, %v457_v7  ;;  %vm463_vm0 = vweird.f32 %v457_v7  ;;  %v467_v27 = vand.u32 2147483647, %v457_v7 }
 0x7f0   :  { %v470_v29 = vor.u32 1.1754944e-38, %v469_v26  ;;  %vm468_vm4 = vcmp.eq.f32.partialorder %v467_v27, 8.507059e+37 }
 0x7f4   :  { %v1647_v8 = vpop.eup %1646 }
 0x7f5   :  { %v459_v22 = vmul.f32 %v1647_v8, %v457_v7  ;;  %vm464_vm15 = vweird.f32 %v1647_v8 }
 0x7f6   :  { %vm465_vm3 = vmor %vm463_vm0, %vm464_vm15 }
 0x7f7   :  { %v460_v23 = vsub.f32 1.0, %v459_v22 }
 0x7f9   :  { %v461_v24 = vmul.f32 %v1647_v8, %v460_v23 }
 0x7fb   :  { %v462_v25 = vadd.f32 %v1647_v8, %v461_v24  ;;  %v201_v24 = vpop.f32.mrf.mxu1 }
 0x7fd   :  { %v466_v28 = vsel %vm465_vm3, %v1647_v8, %v462_v25  ;;  %v202_v25 = vadd.f32 %v201_v24, %v2049_v39 }
 0x7fe   :  { %v471_v31 = vsel %vm468_vm4, %v470_v29, %v466_v28 }
 0x7ff   :  { %v474_v33 = vmul.f32 %v471_v31, %v413_v10 }
 0x85c   :  { %v477_v30 = vpop.permute.xlu1 %476 }
 0x85d   :  { %v479_v32 = vmul.f32 %v477_v30, %v471_v31 }
 0x85f   :  { %481 = vrot.lane.b32.xlu2 %v479_v32, %s1854_s24 }
 0x8b9   :  { %v482_v34 = vpop.permute.xlu2 %481 }
 0x8ba   :  { %v484_v35 = vadd.f32 %v482_v34, %v474_v33 }
 0x8bc   :  { %1648 = vtanh.f32 %v484_v35 }
 0x8c2   :  { %v1649_v38 = vpop.eup %1648 }
 0x8c3   :  { %v490_v40 = vadd.f32 %v1649_v38, %v488_v36 }
 0x8c5   :  { %492 = vrot.lane.b32.xlu1 %v490_v40, %s1854_s24 }
 0x937   :  { %v493_v41 = vpop.permute.xlu1 %492 }
 0x938   :  { %v2157_v42 = vmul.f32 %v493_v41, %v471_v31 }
 0x93a   :  { %497 = vrot.lane.b32.xlu2 %v2157_v42, %s1855_s6 }
 0x942   :  { %558 = vrot.lane.b32.xlu2 %v199_v54, %s1854_s24  ;;  %v164_v54 = vadd.f32 %v163_v53, %v2044_v18  ;;  %v2212_v53 = vld [vmem:[#allocation5 + $0x38] sm:$0xff] }
 0x943   :  { %869 = vmatpush.msrb.mxu1 %v2212_v53 }
 0x994   :  { %v498_v43 = vpop.permute.xlu2 %497 }
 0x995   :  { %v500_v44 = vsel %vm214_vm1, %v498_v43, %v484_v35  ;;  %1570 = vmatmul.msk.f32.gmra.mxu0 %vm214_vm1, %v498_v43 }
 0x996   :  { %1559 = vmatmul.msk.f32.vlgmr.msra.gmra.mxu2 %vm216_vm2, %v500_v44 }
 0x997   :  { %939 = vmatpush.msra.mxu2 %v2212_v53 }
 0x99c   :  { %v559_v16 = vpop.permute.xlu2 %558 }
 0xa19   :  { %v521_v47 = vpop.f32.mrf.mxu2 }
 0xa1a   :  { %v524_v48 = vadd.f32 %v521_v47, %v158_v46 }
 0xa1c   :  { %1650 = vtanh.f32 %v524_v48  ;;  %v1560_v50 = vmul.f32 -1.442695, %v524_v48 }
 0xa1e   :  { %1652 = vpow2.f32 %v1560_v50 }
 0xa22   :  { %v1651_v49 = vpop.eup %1650 }
 0xa23   :  { %547 = vrot.lane.b32.xlu0 %v1651_v49, %s1854_s24 }
 0xa24   :  { %v1653_v51 = vpop.eup %1652 }
 0xa25   :  { %v528_v52 = vadd.f32 1.0, %v1653_v51  ;;  %v204_v51 = vpop.f32.mrf.mxu1 }
 0xa27   :  { %1654 = vrcp.f32 %v528_v52  ;;  %v540_v61 = vand.u32 2147483648, %v528_v52  ;;  %vm534_vm6 = vweird.f32 %v528_v52  ;;  %v538_v62 = vand.u32 2147483647, %v528_v52 }
 0xa29   :  { %v541_v0 = vor.u32 1.1754944e-38, %v540_v61  ;;  %vm539_vm8 = vcmp.eq.f32.partialorder %v538_v62, 8.507059e+37 }
 0xa2d   :  { %v1655_v55 = vpop.eup %1654 }
 0xa2e   :  { %v530_v56 = vmul.f32 %v1655_v55, %v528_v52  ;;  %vm535_vm5 = vweird.f32 %v1655_v55  ;;  %v205_v52 = vadd.f32 %v204_v51, %v2049_v39 }
 0xa2f   :  { %vm536_vm7 = vmor %vm534_vm6, %vm535_vm5 }
 0xa30   :  { %v531_v58 = vsub.f32 1.0, %v530_v56 }
 0xa32   :  { %v532_v59 = vmul.f32 %v1655_v55, %v531_v58 }
 0xa34   :  { %v533_v60 = vadd.f32 %v1655_v55, %v532_v59 }
 0xa36   :  { %v537_v63 = vsel %vm536_vm7, %v1655_v55, %v533_v60 }
 0xa37   :  { %v542_v10 = vsel %vm539_vm8, %v541_v0, %v537_v63 }
 0xa38   :  { %v545_v12 = vmul.f32 %v542_v10, %v484_v35 }
 0xa95   :  { %v548_v9 = vpop.permute.xlu0 %547 }
 0xa96   :  { %v550_v11 = vmul.f32 %v548_v9, %v542_v10 }
 0xa98   :  { %552 = vrot.lane.b32.xlu1 %v550_v11, %s1854_s24 }
 0xb0a   :  { %v553_v13 = vpop.permute.xlu1 %552 }
 0xb0b   :  { %v555_v14 = vadd.f32 %v553_v13, %v545_v12 }
 0xb0d   :  { %1656 = vtanh.f32 %v555_v14 }
 0xb13   :  { %v1657_v17 = vpop.eup %1656 }
 0xb14   :  { %v561_v19 = vadd.f32 %v1657_v17, %v559_v16 }
 0xb16   :  { %563 = vrot.lane.b32.xlu0 %v561_v19, %s1854_s24 }
 0xb88   :  { %v564_v20 = vpop.permute.xlu0 %563 }
 0xb89   :  { %v2170_v1 = vmul.f32 %v564_v20, %v542_v10 }
 0xb8b   :  { %568 = vrot.lane.b32.xlu1 %v2170_v1, %s1855_s6 }
 0xb93   :  { %629 = vrot.lane.b32.xlu1 %v202_v25, %s1854_s24 }
 0xbfd   :  { %v569_v2 = vpop.permute.xlu1 %568 }
 0xbfe   :  { %v571_v21 = vsel %vm214_vm1, %v569_v2, %v555_v14  ;;  %1571 = vmatmul.msk.f32.gmra.mxu0 %vm214_vm1, %v569_v2 }
 0xbff   :  { %1561 = vmatmul.msk.f32.vlgmr.msra.gmra.mxu3 %vm216_vm2, %v571_v21 }
 0xc00   :  { %1009 = vmatpush.msra.mxu3 %v2212_v53 }
 0xc05   :  { %v630_v44 = vpop.permute.xlu1 %629 }
 0xc82   :  { %v592_v5 = vpop.f32.mrf.mxu3 }
 0xc83   :  { %v595_v6 = vadd.f32 %v592_v5, %v161_v4 }
 0xc85   :  { %1658 = vtanh.f32 %v595_v6  ;;  %v1562_v8 = vmul.f32 -1.442695, %v595_v6 }
 0xc87   :  { %1660 = vpow2.f32 %v1562_v8 }
 0xc8b   :  { %v1659_v7 = vpop.eup %1658 }
 0xc8c   :  { %618 = vrot.lane.b32.xlu2 %v1659_v7, %s1854_s24 }
 0xc8d   :  { %v1661_v22 = vpop.eup %1660 }
 0xc8e   :  { %v599_v23 = vadd.f32 1.0, %v1661_v22 }
 0xc90   :  { %1662 = vrcp.f32 %v599_v23  ;;  %v611_v31 = vand.u32 2147483648, %v599_v23  ;;  %vm605_vm10 = vweird.f32 %v599_v23  ;;  %v609_v32 = vand.u32 2147483647, %v599_v23 }
 0xc92   :  { %v612_v34 = vor.u32 1.1754944e-38, %v611_v31  ;;  %vm610_vm12 = vcmp.eq.f32.partialorder %v609_v32, 8.507059e+37  ;;  %v207_v31 = vpop.f32.mrf.mxu1 }
 0xc93   :  { %v208_v32 = vadd.f32 %v207_v31, %v2049_v39 }
 0xc96   :  { %v1663_v26 = vpop.eup %1662 }
 0xc97   :  { %v601_v27 = vmul.f32 %v1663_v26, %v599_v23  ;;  %vm606_vm9 = vweird.f32 %v1663_v26  ;;  %v166_v23 = vpop.f32.mrf.mxu0 }
 0xc98   :  { %vm607_vm11 = vmor %vm605_vm10, %vm606_vm9  ;;  %v167_v24 = vadd.f32 %v166_v23, %v2044_v18 }
 0xc99   :  { %v602_v28 = vsub.f32 1.0, %v601_v27 }
 0xc9b   :  { %v603_v29 = vmul.f32 %v1663_v26, %v602_v28 }
 0xc9d   :  { %v604_v30 = vadd.f32 %v1663_v26, %v603_v29 }
 0xc9f   :  { %v608_v33 = vsel %vm607_vm11, %v1663_v26, %v604_v30 }
 0xca0   :  { %v613_v36 = vsel %vm610_vm12, %v612_v34, %v608_v33 }
 0xca1   :  { %v616_v40 = vmul.f32 %v613_v36, %v555_v14 }
 0xce6   :  { %v619_v35 = vpop.permute.xlu2 %618 }
 0xce7   :  { %v621_v38 = vmul.f32 %v619_v35, %v613_v36 }
 0xce9   :  { %623 = vrot.lane.b32.xlu0 %v621_v38, %s1854_s24 }
 0xd5b   :  { %v624_v41 = vpop.permute.xlu0 %623 }
 0xd5c   :  { %v626_v43 = vadd.f32 %v624_v41, %v616_v40 }
 0xd5e   :  { %1664 = vtanh.f32 %v626_v43 }
 0xd64   :  { %v1665_v45 = vpop.eup %1664 }
 0xd65   :  { %v632_v46 = vadd.f32 %v1665_v45, %v630_v44 }
 0xd67   :  { %634 = vrot.lane.b32.xlu2 %v632_v46, %s1854_s24 }
 0xdc1   :  { %v635_v47 = vpop.permute.xlu2 %634 }
 0xdc2   :  { %v2183_v48 = vmul.f32 %v635_v47, %v613_v36 }
 0xdc4   :  { %639 = vrot.lane.b32.xlu0 %v2183_v48, %s1855_s6 }
 0xdcc   :  { %700 = vrot.lane.b32.xlu0 %v205_v52, %s1854_s24 }
 0xe36   :  { %v640_v49 = vpop.permute.xlu0 %639 }
 0xe37   :  { %v642_v50 = vsel %vm214_vm1, %v640_v49, %v626_v43  ;;  %1572 = vmatmul.msk.f32.gmra.mxu0 %vm214_vm1, %v640_v49 }
 0xe38   :  { %1563 = vmatmul.msk.f32.vlgmr.msrb.gmra.mxu2 %vm216_vm2, %v642_v50 }
 0xe3e   :  { %v701_v3 = vpop.permute.xlu0 %700 }
 0xebb   :  { %v663_v55 = vpop.f32.mrf.mxu2 }
 0xebc   :  { %v666_v56 = vadd.f32 %v663_v55, %v164_v54  ;;  %v2214_v54 = vld [vmem:[#allocation5 + $0x30] sm:$0xff]  ;;  %v2218_v55 = vld [vmem:[#allocation5 + $0x28] sm:$0xff] }
 0xebd   :  { %870 = vmatpush.msrb.mxu1 %v2214_v54  ;;  %940 = vmatpush.msra.mxu2 %v2214_v54 }
 0xebe   :  { %1666 = vtanh.f32 %v666_v56  ;;  %v1564_v59 = vmul.f32 -1.442695, %v666_v56  ;;  %v2223_v56 = vld [vmem:[#allocation5 + $0x20] sm:$0xff]  ;;  %1010 = vmatpush.msra.mxu3 %v2214_v54 }
 0xebf   :  { %871 = vmatpush.msrb.mxu1 %v2218_v55  ;;  %941 = vmatpush.msra.mxu2 %v2218_v55 }
 0xec0   :  { %1668 = vpow2.f32 %v1564_v59  ;;  %1011 = vmatpush.msra.mxu3 %v2218_v55  ;;  %v2233_v59 = vld [vmem:[#allocation5 + $0x10] sm:$0xff] }
 0xec1   :  { %872 = vmatpush.msrb.mxu1 %v2223_v56  ;;  %942 = vmatpush.msra.mxu2 %v2223_v56 }
 0xec2   :  { %1012 = vmatpush.msra.mxu3 %v2223_v56 }
 0xec4   :  { %v1667_v58 = vpop.eup %1666 }
 0xec5   :  { %689 = vrot.lane.b32.xlu1 %v1667_v58, %s1854_s24  ;;  %v2228_v58 = vld [vmem:[#allocation5 + $0x18] sm:$0xff] }
 0xec6   :  { %v1669_v60 = vpop.eup %1668  ;;  %873 = vmatpush.msrb.mxu1 %v2228_v58  ;;  %943 = vmatpush.msra.mxu2 %v2228_v58 }
 0xec7   :  { %v670_v61 = vadd.f32 1.0, %v1669_v60  ;;  %v2238_v60 = vld [vmem:[#allocation5 + $0x8] sm:$0xff]  ;;  %1013 = vmatpush.msra.mxu3 %v2228_v58 }
 0xec8   :  { %874 = vmatpush.msrb.mxu1 %v2233_v59  ;;  %944 = vmatpush.msra.mxu2 %v2233_v59 }
 0xec9   :  { %1670 = vrcp.f32 %v670_v61  ;;  %v682_v11 = vand.u32 2147483648, %v670_v61  ;;  %vm676_vm14 = vweird.f32 %v670_v61  ;;  %v680_v12 = vand.u32 2147483647, %v670_v61  ;;  %1014 = vmatpush.msra.mxu3 %v2233_v59 }
 0xeca   :  { %875 = vmatpush.msrb.mxu1 %v2238_v60  ;;  %945 = vmatpush.msra.mxu2 %v2238_v60 }
 0xecb   :  { %v683_v14 = vor.u32 1.1754944e-38, %v682_v11  ;;  %vm681_vm0 = vcmp.eq.f32.partialorder %v680_v12, 8.507059e+37  ;;  %1015 = vmatpush.msra.mxu3 %v2238_v60 }
 0xecf   :  { %v1671_v62 = vpop.eup %1670 }
 0xed0   :  { %v672_v63 = vmul.f32 %v1671_v62, %v670_v61  ;;  %vm677_vm13 = vweird.f32 %v1671_v62  ;;  %v2243_v61 = vld [vmem:[#allocation5] sm:$0xff] }
 0xed1   :  { %vm678_vm15 = vmor %vm676_vm14, %vm677_vm13  ;;  %876 = vmatpush.msrb.mxu1 %v2243_v61  ;;  %946 = vmatpush.msra.mxu2 %v2243_v61 }
 0xed2   :  { %v673_v0 = vsub.f32 1.0, %v672_v63  ;;  %1016 = vmatpush.msra.mxu3 %v2243_v61 }
 0xed3   :  { %1079 = vmatpush.msra.mxu1 %v2212_v53  ;;  %1149 = vmatpush.msrb.mxu2 %v2212_v53 }
 0xed4   :  { %v674_v9 = vmul.f32 %v1671_v62, %v673_v0 }
 0xed5   :  { %1080 = vmatpush.msra.mxu1 %v2214_v54  ;;  %1150 = vmatpush.msrb.mxu2 %v2214_v54 }
 0xed6   :  { %v675_v10 = vadd.f32 %v1671_v62, %v674_v9 }
 0xed7   :  { %1081 = vmatpush.msra.mxu1 %v2218_v55  ;;  %1151 = vmatpush.msrb.mxu2 %v2218_v55 }
 0xed8   :  { %v679_v13 = vsel %vm678_vm15, %v1671_v62, %v675_v10  ;;  %v832_v10 = vpop.f32.mrf.mxu0 }
 0xed9   :  { %v684_v17 = vsel %vm681_vm0, %v683_v14, %v679_v13  ;;  %1082 = vmatpush.msra.mxu1 %v2223_v56  ;;  %1152 = vmatpush.msrb.mxu2 %v2223_v56 }
 0xeda   :  { %v687_v20 = vmul.f32 %v684_v17, %v626_v43 }
 0xedb   :  { %1083 = vmatpush.msra.mxu1 %v2228_v58  ;;  %1153 = vmatpush.msrb.mxu2 %v2228_v58 }
 0xedd   :  { %1084 = vmatpush.msra.mxu1 %v2233_v59  ;;  %1154 = vmatpush.msrb.mxu2 %v2233_v59 }
 0xedf   :  { %1085 = vmatpush.msra.mxu1 %v2238_v60  ;;  %1155 = vmatpush.msrb.mxu2 %v2238_v60 }
 0xee1   :  { %1086 = vmatpush.msra.mxu1 %v2243_v61  ;;  %1156 = vmatpush.msrb.mxu2 %v2243_v61 }
 0xf37   :  { %v690_v16 = vpop.permute.xlu1 %689 }
 0xf38   :  { %v692_v19 = vmul.f32 %v690_v16, %v684_v17 }
 0xf3a   :  { %694 = vrot.lane.b32.xlu2 %v692_v19, %s1854_s24 }
 0xf94   :  { %v695_v2 = vpop.permute.xlu2 %694 }
 0xf95   :  { %v697_v21 = vadd.f32 %v695_v2, %v687_v20 }
 0xf97   :  { %1672 = vtanh.f32 %v697_v21 }
 0xf9d   :  { %v1673_v4 = vpop.eup %1672 }
 0xf9e   :  { %v703_v5 = vadd.f32 %v1673_v4, %v701_v3 }
 0xfa0   :  { %705 = vrot.lane.b32.xlu1 %v703_v5, %s1854_s24 }
0x1012   :  { %v706_v6 = vpop.permute.xlu1 %705 }
0x1013   :  { %v2196_v7 = vmul.f32 %v706_v6, %v684_v17 }
0x1015   :  { %710 = vrot.lane.b32.xlu2 %v2196_v7, %s1855_s6 }
0x101d   :  { %771 = vrot.lane.b32.xlu2 %v208_v32, %s1854_s24 }
0x106f   :  { %v711_v8 = vpop.permute.xlu2 %710 }
0x1070   :  { %v713_v22 = vsel %vm214_vm1, %v711_v8, %v697_v21  ;;  %1573 = vmatmul.msk.f32.gmra.mxu0 %vm214_vm1, %v711_v8 }
0x1071   :  { %1565 = vmatmul.msk.f32.vlgmr.msrb.gmra.mxu3 %vm216_vm2, %v713_v22 }
0x1072   :  { %1219 = vmatpush.msrb.mxu3 %v2212_v53 }
0x1074   :  { %1220 = vmatpush.msrb.mxu3 %v2214_v54 }
0x1076   :  { %1221 = vmatpush.msrb.mxu3 %v2218_v55 }
0x1077   :  { %v772_v50 = vpop.permute.xlu2 %771 }
0x1078   :  { %1222 = vmatpush.msrb.mxu3 %v2223_v56 }
0x107a   :  { %1223 = vmatpush.msrb.mxu3 %v2228_v58 }
0x107c   :  { %1224 = vmatpush.msrb.mxu3 %v2233_v59 }
0x107e   :  { %1225 = vmatpush.msrb.mxu3 %v2238_v60 }
0x1080   :  { %1226 = vmatpush.msrb.mxu3 %v2243_v61 }
0x10f4   :  { %v734_v25 = vpop.f32.mrf.mxu3 }
0x10f5   :  { %v737_v26 = vadd.f32 %v734_v25, %v167_v24 }
0x10f7   :  { %1674 = vtanh.f32 %v737_v26  ;;  %v1566_v28 = vmul.f32 -1.442695, %v737_v26 }
0x10f9   :  { %1676 = vpow2.f32 %v1566_v28 }
0x10fd   :  { %v1675_v27 = vpop.eup %1674 }
0x10fe   :  { %760 = vrot.lane.b32.xlu0 %v1675_v27, %s1854_s24 }
0x10ff   :  { %v1677_v29 = vpop.eup %1676 }
0x1100   :  { %v741_v30 = vadd.f32 1.0, %v1677_v29 }
0x1102   :  { %1678 = vrcp.f32 %v741_v30  ;;  %v753_v38 = vand.u32 2147483648, %v741_v30  ;;  %vm747_vm4 = vweird.f32 %v741_v30  ;;  %v751_v40 = vand.u32 2147483647, %v741_v30 }
0x1104   :  { %v754_v43 = vor.u32 1.1754944e-38, %v753_v38  ;;  %vm752_vm6 = vcmp.eq.f32.partialorder %v751_v40, 8.507059e+37 }
0x1108   :  { %v1679_v33 = vpop.eup %1678 }
0x1109   :  { %v743_v34 = vmul.f32 %v1679_v33, %v741_v30  ;;  %vm748_vm3 = vweird.f32 %v1679_v33 }
0x110a   :  { %vm749_vm5 = vmor %vm747_vm4, %vm748_vm3 }
0x110b   :  { %v744_v35 = vsub.f32 1.0, %v743_v34 }
0x110d   :  { %v745_v18 = vmul.f32 %v1679_v33, %v744_v35 }
0x110f   :  { %v746_v36 = vadd.f32 %v1679_v33, %v745_v18 }
0x1111   :  { %v750_v41 = vsel %vm749_vm5, %v1679_v33, %v746_v36 }
0x1112   :  { %v755_v45 = vsel %vm752_vm6, %v754_v43, %v750_v41 }
0x1113   :  { %v758_v39 = vmul.f32 %v755_v45, %v697_v21 }
0x1170   :  { %v761_v44 = vpop.permute.xlu0 %760 }
0x1171   :  { %v763_v46 = vmul.f32 %v761_v44, %v755_v45 }
0x1173   :  { %765 = vrot.lane.b32.xlu1 %v763_v46, %s1854_s24 }
0x11e5   :  { %v766_v47 = vpop.permute.xlu1 %765 }
0x11e6   :  { %v2208_v49 = vadd.f32 %v766_v47, %v758_v39 }
0x11e8   :  { %1680 = vtanh.f32 %v2208_v49 }
0x11ee   :  { %v1681_v51 = vpop.eup %1680 }
0x11ef   :  { %v774_v52 = vadd.f32 %v1681_v51, %v772_v50 }
0x11f1   :  { %776 = vrot.lane.b32.xlu0 %v774_v52, %s1854_s24 }
0x1263   :  { %v777_v62 = vpop.permute.xlu0 %776 }
0x1264   :  { %v2261_v63 = vmul.f32 %v777_v62, %v755_v45 }
0x1266   :  { %797 = vrot.lane.b32.xlu1 %v2261_v63, %s1855_s6 }
0x126e   :  { %914 = vrot.lane.b32.xlu1 %v2077_v57, %s1856_s0  ;;  %v2297_v57 = vld [vmem:[%s2478_s7] ss:$0 sm:$0xff]  ;;  %s1504_s7 = sshll.u32 %s1857_s23, 4  ;;  %s1505_s7 = int_to_ptr.vmem [resolvable:$true] %s1504_s7 }
0x126f   :  { %v833_v11 = vadd.f32 %v2297_v57, %v832_v10 }
0x12d8   :  { %v798_v0 = vpop.permute.xlu1 %797 }
0x12d9   :  { %v857_v9 = vsel %vm214_vm1, %v798_v0, %v2208_v49  ;;  %1574 = vmatmul.msk.f32.gmra.mxu0 %vm214_vm1, %v798_v0 }
0x12da   :  { %1575 = vmatmul.msk.f32.vlgmr.msrb.gmra.mxu1 %vm216_vm2, %v857_v9 }
0x12db   :  { %1289 = vmatpush.msrb.mxu1 %v2212_v53 }
0x12dd   :  { %1290 = vmatpush.msrb.mxu1 %v2214_v54 }
0x12df   :  { %1291 = vmatpush.msrb.mxu1 %v2218_v55 }
0x12e0   :  { %v915_v30 = vpop.permute.xlu1 %914 }
0x12e1   :  { %1292 = vmatpush.msrb.mxu1 %v2223_v56 }
0x12e3   :  { %1293 = vmatpush.msrb.mxu1 %v2228_v58 }
0x12e5   :  { %1294 = vmatpush.msrb.mxu1 %v2233_v59 }
0x12e7   :  { %1295 = vmatpush.msrb.mxu1 %v2238_v60 }
0x12e9   :  { %1296 = vmatpush.msrb.mxu1 %v2243_v61 }
0x1357   :  { %v878_v12 = vpop.f32.mrf.mxu1 }
0x1358   :  { %v881_v13 = vadd.f32 %v878_v12, %v833_v11 }
0x135a   :  { %1682 = vtanh.f32 %v881_v13  ;;  %v1576_v16 = vmul.f32 -1.442695, %v881_v13 }
0x135c   :  { %1684 = vpow2.f32 %v1576_v16 }
0x1360   :  { %v1683_v14 = vpop.eup %1682 }
0x1361   :  { %904 = vrot.lane.b32.xlu2 %v1683_v14, %s1854_s24 }
0x1362   :  { %v1685_v17 = vpop.eup %1684 }
0x1363   :  { %v885_v19 = vadd.f32 1.0, %v1685_v17 }
0x1365   :  { %1686 = vrcp.f32 %v885_v19  ;;  %v897_v5 = vand.u32 2147483648, %v885_v19  ;;  %vm891_vm8 = vweird.f32 %v885_v19  ;;  %v895_v6 = vand.u32 2147483647, %v885_v19 }
0x1367   :  { %v898_v22 = vor.u32 1.1754944e-38, %v897_v5  ;;  %vm896_vm10 = vcmp.eq.f32.partialorder %v895_v6, 8.507059e+37 }
0x136b   :  { %v1687_v20 = vpop.eup %1686 }
0x136c   :  { %v887_v2 = vmul.f32 %v1687_v20, %v885_v19  ;;  %vm892_vm7 = vweird.f32 %v1687_v20 }
0x136d   :  { %vm893_vm9 = vmor %vm891_vm8, %vm892_vm7 }
0x136e   :  { %v888_v21 = vsub.f32 1.0, %v887_v2 }
0x1370   :  { %v889_v3 = vmul.f32 %v1687_v20, %v888_v21 }
0x1372   :  { %v890_v4 = vadd.f32 %v1687_v20, %v889_v3 }
0x1374   :  { %v894_v8 = vsel %vm893_vm9, %v1687_v20, %v890_v4 }
0x1375   :  { %v899_v24 = vsel %vm896_vm10, %v898_v22, %v894_v8 }
0x1376   :  { %v902_v26 = vmul.f32 %v899_v24, %v2208_v49 }
0x13bb   :  { %v905_v23 = vpop.permute.xlu2 %904 }
0x13bc   :  { %v907_v25 = vmul.f32 %v905_v23, %v899_v24 }
0x13be   :  { %909 = vrot.lane.b32.xlu0 %v907_v25, %s1854_s24 }
0x1430   :  { %v910_v27 = vpop.permute.xlu0 %909 }
0x1431   :  { %v912_v28 = vadd.f32 %v910_v27, %v902_v26 }
0x1433   :  { %1688 = vtanh.f32 %v912_v28 }
0x1439   :  { %v1689_v29 = vpop.eup %1688 }
0x143a   :  { %v917_v31 = vadd.f32 %v1689_v29, %v915_v30 }
0x143c   :  { %919 = vrot.lane.b32.xlu2 %v917_v31, %s1854_s24 }
0x1496   :  { %v920_v32 = vpop.permute.xlu2 %919 }
0x1497   :  { %v922_v33 = vmul.f32 %v920_v32, %v899_v24 }
0x1499   :  { %924 = vrot.lane.b32.xlu0 %v922_v33, %s1855_s6 }
0x14a1   :  { %984 = vrot.lane.b32.xlu0 %v2115_v37, %s1856_s0  ;;  %v835_v37 = vpop.f32.mrf.mxu0 }
0x14a2   :  { %v836_v18 = vadd.f32 %v2297_v57, %v835_v37 }
0x14a9   :  { %v838_v13 = vpop.f32.mrf.mxu0 }
0x14aa   :  { %v839_v14 = vadd.f32 %v2297_v57, %v838_v13 }
0x150b   :  { %v2307_v34 = vpop.permute.xlu0 %924 }
0x150c   :  { %v927_v35 = vsel %vm214_vm1, %v2307_v34, %v912_v28 }
0x150d   :  { %1577 = vmatmul.msk.f32.vlgmr.msra.gmra.mxu2 %vm216_vm2, %v927_v35 }
0x150e   :  { %1359 = vmatpush.msra.mxu2 %v2212_v53 }
0x1510   :  { %1360 = vmatpush.msra.mxu2 %v2214_v54 }
0x1512   :  { %1361 = vmatpush.msra.mxu2 %v2218_v55 }
0x1513   :  { %v985_v62 = vpop.permute.xlu0 %984 }
0x1514   :  { %1362 = vmatpush.msra.mxu2 %v2223_v56 }
0x1516   :  { %1363 = vmatpush.msra.mxu2 %v2228_v58 }
0x1518   :  { %1364 = vmatpush.msra.mxu2 %v2233_v59 }
0x151a   :  { %1365 = vmatpush.msra.mxu2 %v2238_v60 }
0x151c   :  { %1366 = vmatpush.msra.mxu2 %v2243_v61 }
0x1590   :  { %v948_v36 = vpop.f32.mrf.mxu2 }
0x1591   :  { %v951_v38 = vadd.f32 %v948_v36, %v836_v18 }
0x1593   :  { %1690 = vtanh.f32 %v951_v38  ;;  %v1578_v41 = vmul.f32 -1.442695, %v951_v38  ;;  %v841_v38 = vpop.f32.mrf.mxu0 }
0x1595   :  { %1692 = vpow2.f32 %v1578_v41 }
0x1599   :  { %v1691_v40 = vpop.eup %1690 }
0x159a   :  { %974 = vrot.lane.b32.xlu1 %v1691_v40, %s1854_s24  ;;  %v842_v40 = vadd.f32 %v2297_v57, %v841_v38 }
0x159b   :  { %v1693_v43 = vpop.eup %1692 }
0x159c   :  { %v955_v44 = vadd.f32 1.0, %v1693_v43 }
0x159e   :  { %1694 = vrcp.f32 %v955_v44  ;;  %v967_v50 = vand.u32 2147483648, %v955_v44  ;;  %vm961_vm12 = vweird.f32 %v955_v44  ;;  %v965_v51 = vand.u32 2147483647, %v955_v44 }
0x15a0   :  { %v968_v53 = vor.u32 1.1754944e-38, %v967_v50  ;;  %vm966_vm14 = vcmp.eq.f32.partialorder %v965_v51, 8.507059e+37 }
0x15a4   :  { %v1695_v45 = vpop.eup %1694 }
0x15a5   :  { %v957_v46 = vmul.f32 %v1695_v45, %v955_v44  ;;  %vm962_vm11 = vweird.f32 %v1695_v45 }
0x15a6   :  { %vm963_vm13 = vmor %vm961_vm12, %vm962_vm11 }
0x15a7   :  { %v958_v39 = vsub.f32 1.0, %v957_v46 }
0x15a9   :  { %v959_v47 = vmul.f32 %v1695_v45, %v958_v39 }
0x15ab   :  { %v960_v49 = vadd.f32 %v1695_v45, %v959_v47 }
0x15ad   :  { %v964_v52 = vsel %vm963_vm13, %v1695_v45, %v960_v49  ;;  %vm1488_vm13 = vcmask 80896  }
0x15ae   :  { %v969_v55 = vsel %vm966_vm14, %v968_v53, %v964_v52 }
0x15af   :  { %v972_v58 = vmul.f32 %v969_v55, %v912_v28 }
0x160c   :  { %v975_v54 = vpop.permute.xlu1 %974 }
0x160d   :  { %v977_v56 = vmul.f32 %v975_v54, %v969_v55 }
0x160f   :  { %979 = vrot.lane.b32.xlu2 %v977_v56, %s1854_s24 }
0x1669   :  { %v980_v59 = vpop.permute.xlu2 %979 }
0x166a   :  { %v982_v60 = vadd.f32 %v980_v59, %v972_v58 }
0x166c   :  { %1696 = vtanh.f32 %v982_v60 }
0x1672   :  { %v1697_v61 = vpop.eup %1696 }
0x1673   :  { %v987_v0 = vadd.f32 %v1697_v61, %v985_v62 }
0x1675   :  { %989 = vrot.lane.b32.xlu1 %v987_v0, %s1854_s24 }
0x16e7   :  { %v990_v9 = vpop.permute.xlu1 %989 }
0x16e8   :  { %v992_v10 = vmul.f32 %v990_v9, %v969_v55 }
0x16ea   :  { %994 = vrot.lane.b32.xlu2 %v992_v10, %s1855_s6 }
0x16f2   :  { %1054 = vrot.lane.b32.xlu2 %v2136_v15, %s1856_s0 }
0x1744   :  { %v2327_v11 = vpop.permute.xlu2 %994 }
0x1745   :  { %v997_v12 = vsel %vm214_vm1, %v2327_v11, %v982_v60 }
0x1746   :  { %1579 = vmatmul.msk.f32.vlgmr.msra.gmra.mxu3 %vm216_vm2, %v997_v12 }
0x174c   :  { %v1055_v32 = vpop.permute.xlu2 %1054 }
0x17c9   :  { %v1018_v16 = vpop.f32.mrf.mxu3 }
0x17ca   :  { %v1021_v17 = vadd.f32 %v1018_v16, %v839_v14 }
0x17cc   :  { %1698 = vtanh.f32 %v1021_v17  ;;  %v1580_v20 = vmul.f32 -1.442695, %v1021_v17  ;;  %v844_v17 = vpop.f32.mrf.mxu0 }
0x17ce   :  { %1700 = vpow2.f32 %v1580_v20 }
0x17d2   :  { %v1699_v19 = vpop.eup %1698 }
0x17d3   :  { %1044 = vrot.lane.b32.xlu0 %v1699_v19, %s1854_s24  ;;  %v845_v19 = vadd.f32 %v2297_v57, %v844_v17 }
0x17d4   :  { %v1701_v2 = vpop.eup %1700 }
0x17d5   :  { %v1025_v15 = vadd.f32 1.0, %v1701_v2 }
0x17d7   :  { %1702 = vrcp.f32 %v1025_v15  ;;  %v1037_v8 = vand.u32 2147483648, %v1025_v15  ;;  %vm1031_vm0 = vweird.f32 %v1025_v15  ;;  %v1035_v22 = vand.u32 2147483647, %v1025_v15 }
0x17d9   :  { %v1038_v24 = vor.u32 1.1754944e-38, %v1037_v8  ;;  %vm1036_vm4 = vcmp.eq.f32.partialorder %v1035_v22, 8.507059e+37 }
0x17dd   :  { %v1703_v21 = vpop.eup %1702 }
0x17de   :  { %v1027_v3 = vmul.f32 %v1703_v21, %v1025_v15  ;;  %vm1032_vm15 = vweird.f32 %v1703_v21 }
0x17df   :  { %vm1033_vm3 = vmor %vm1031_vm0, %vm1032_vm15 }
0x17e0   :  { %v1028_v4 = vsub.f32 1.0, %v1027_v3 }
0x17e2   :  { %v1029_v5 = vmul.f32 %v1703_v21, %v1028_v4 }
0x17e4   :  { %v1030_v6 = vadd.f32 %v1703_v21, %v1029_v5 }
0x17e6   :  { %v1034_v23 = vsel %vm1033_vm3, %v1703_v21, %v1030_v6 }
0x17e7   :  { %v1039_v26 = vsel %vm1036_vm4, %v1038_v24, %v1034_v23 }
0x17e8   :  { %v1042_v28 = vmul.f32 %v1039_v26, %v982_v60 }
0x1845   :  { %v1045_v25 = vpop.permute.xlu0 %1044 }
0x1846   :  { %v1047_v27 = vmul.f32 %v1045_v25, %v1039_v26 }
0x1848   :  { %1049 = vrot.lane.b32.xlu1 %v1047_v27, %s1854_s24 }
0x18ba   :  { %v1050_v29 = vpop.permute.xlu1 %1049 }
0x18bb   :  { %v1052_v30 = vadd.f32 %v1050_v29, %v1042_v28 }
0x18bd   :  { %1704 = vtanh.f32 %v1052_v30 }
0x18c3   :  { %v1705_v31 = vpop.eup %1704 }
0x18c4   :  { %v1057_v33 = vadd.f32 %v1705_v31, %v1055_v32 }
0x18c6   :  { %1059 = vrot.lane.b32.xlu0 %v1057_v33, %s1854_s24 }
0x1938   :  { %v1060_v35 = vpop.permute.xlu0 %1059 }
0x1939   :  { %v1062_v37 = vmul.f32 %v1060_v35, %v1039_v26 }
0x193b   :  { %1064 = vrot.lane.b32.xlu1 %v1062_v37, %s1855_s6 }
0x1943   :  { %1124 = vrot.lane.b32.xlu1 %v2157_v42, %s1856_s0 }
0x19ad   :  { %v2339_v18 = vpop.permute.xlu1 %1064 }
0x19ae   :  { %v1067_v36 = vsel %vm214_vm1, %v2339_v18, %v1052_v30 }
0x19af   :  { %1581 = vmatmul.msk.f32.vlgmr.msra.gmra.mxu1 %vm216_vm2, %v1067_v36 }
0x19b5   :  { %v1125_v9 = vpop.permute.xlu1 %1124 }
0x1a2c   :  { %v1088_v41 = vpop.f32.mrf.mxu1 }
0x1a2d   :  { %v1091_v43 = vadd.f32 %v1088_v41, %v842_v40  ;;  %v1426_v40 = vld [vmem:[%s2480_s9 + $0x18] sm:$0xff]  ;;  %v1425_v41 = vld [vmem:[%s2480_s9 + $0x10] sm:$0xff] }
0x1a2e   :  { %1600 = vmatpush.msra.mxu3 %v1426_v40  ;;  %1459 = vmatpush.msra.mxu1 %v1426_v40 }
0x1a2f   :  { %1706 = vtanh.f32 %v1091_v43  ;;  %v1582_v45 = vmul.f32 -1.442695, %v1091_v43  ;;  %v1424_v43 = vld [vmem:[%s2480_s9 + $0x8] sm:$0xff] }
0x1a30   :  { %1602 = vmatpush.msra.mxu3 %v1425_v41  ;;  %1460 = vmatpush.msra.mxu1 %v1425_v41 }
0x1a31   :  { %1708 = vpow2.f32 %v1582_v45 }
0x1a32   :  { %1604 = vmatpush.msra.mxu3 %v1424_v43  ;;  %1461 = vmatpush.msra.mxu1 %v1424_v43 }
0x1a35   :  { %v1707_v44 = vpop.eup %1706 }
0x1a36   :  { %1114 = vrot.lane.b32.xlu2 %v1707_v44, %s1854_s24 }
0x1a37   :  { %v1709_v46 = vpop.eup %1708 }
0x1a38   :  { %v1095_v42 = vadd.f32 1.0, %v1709_v46  ;;  %v847_v46 = vpop.f32.mrf.mxu0 }
0x1a3a   :  { %1710 = vrcp.f32 %v1095_v42  ;;  %v1107_v52 = vand.u32 2147483648, %v1095_v42  ;;  %vm1101_vm6 = vweird.f32 %v1095_v42  ;;  %v1105_v53 = vand.u32 2147483647, %v1095_v42 }
0x1a3c   :  { %v1108_v55 = vor.u32 1.1754944e-38, %v1107_v52  ;;  %vm1106_vm8 = vcmp.eq.f32.partialorder %v1105_v53, 8.507059e+37 }
0x1a40   :  { %v1711_v39 = vpop.eup %1710 }
0x1a41   :  { %v1097_v47 = vmul.f32 %v1711_v39, %v1095_v42  ;;  %vm1102_vm5 = vweird.f32 %v1711_v39  ;;  %v848_v42 = vadd.f32 %v2297_v57, %v847_v46 }
0x1a42   :  { %vm1103_vm7 = vmor %vm1101_vm6, %vm1102_vm5 }
0x1a43   :  { %v1098_v49 = vsub.f32 1.0, %v1097_v47 }
0x1a45   :  { %v1099_v50 = vmul.f32 %v1711_v39, %v1098_v49  ;;  %v2386_v49 = vld [vmem:[%s2481_s10] ss:$0 sm:$0xff] }
0x1a47   :  { %v1100_v51 = vadd.f32 %v1711_v39, %v1099_v50 }
0x1a49   :  { %v1104_v54 = vsel %vm1103_vm7, %v1711_v39, %v1100_v51 }
0x1a4a   :  { %v1109_v58 = vsel %vm1106_vm8, %v1108_v55, %v1104_v54 }
0x1a4b   :  { %v1112_v60 = vmul.f32 %v1109_v58, %v1052_v30 }
0x1a90   :  { %v1115_v56 = vpop.permute.xlu2 %1114 }
0x1a91   :  { %v1117_v59 = vmul.f32 %v1115_v56, %v1109_v58 }
0x1a93   :  { %1119 = vrot.lane.b32.xlu0 %v1117_v59, %s1854_s24 }
0x1b05   :  { %v1120_v61 = vpop.permute.xlu0 %1119 }
0x1b06   :  { %v1122_v62 = vadd.f32 %v1120_v61, %v1112_v60 }
0x1b08   :  { %1712 = vtanh.f32 %v1122_v62 }
0x1b0e   :  { %v1713_v0 = vpop.eup %1712 }
0x1b0f   :  { %v1127_v10 = vadd.f32 %v1713_v0, %v1125_v9 }
0x1b11   :  { %1129 = vrot.lane.b32.xlu2 %v1127_v10, %s1854_s24 }
0x1b6b   :  { %v1130_v12 = vpop.permute.xlu2 %1129 }
0x1b6c   :  { %v1132_v13 = vmul.f32 %v1130_v12, %v1109_v58 }
0x1b6e   :  { %1134 = vrot.lane.b32.xlu0 %v1132_v13, %s1855_s6 }
0x1b76   :  { %1194 = vrot.lane.b32.xlu0 %v2170_v1, %s1856_s0 }
0x1be0   :  { %v2351_v14 = vpop.permute.xlu0 %1134 }
0x1be1   :  { %v1137_v16 = vsel %vm214_vm1, %v2351_v14, %v1122_v62 }
0x1be2   :  { %1583 = vmatmul.msk.f32.vlgmr.msrb.gmra.mxu2 %vm216_vm2, %v1137_v16 }
0x1be3   :  { %1599 = vmatpush.msrb.mxu2 %v1426_v40 }
0x1be5   :  { %1601 = vmatpush.msrb.mxu2 %v1425_v41 }
0x1be7   :  { %1603 = vmatpush.msrb.mxu2 %v1424_v43 }
0x1be8   :  { %v1195_v35 = vpop.permute.xlu0 %1194 }
0x1c65   :  { %v1158_v20 = vpop.f32.mrf.mxu2 }
0x1c66   :  { %v1161_v2 = vadd.f32 %v1158_v20, %v845_v19 }
0x1c68   :  { %1714 = vtanh.f32 %v1161_v2  ;;  %v1584_v21 = vmul.f32 -1.442695, %v1161_v2 }
0x1c6a   :  { %1716 = vpow2.f32 %v1584_v21 }
0x1c6e   :  { %v1715_v15 = vpop.eup %1714 }
0x1c6f   :  { %1184 = vrot.lane.b32.xlu1 %v1715_v15, %s1854_s24 }
0x1c70   :  { %v1717_v3 = vpop.eup %1716 }
0x1c71   :  { %v1165_v1 = vadd.f32 1.0, %v1717_v3 }
0x1c73   :  { %1718 = vrcp.f32 %v1165_v1  ;;  %v1177_v23 = vand.u32 2147483648, %v1165_v1  ;;  %vm1171_vm10 = vweird.f32 %v1165_v1  ;;  %v1175_v24 = vand.u32 2147483647, %v1165_v1 }
0x1c75   :  { %v1178_v26 = vor.u32 1.1754944e-38, %v1177_v23  ;;  %vm1176_vm12 = vcmp.eq.f32.partialorder %v1175_v24, 8.507059e+37 }
0x1c79   :  { %v1719_v4 = vpop.eup %1718 }
0x1c7a   :  { %v1167_v5 = vmul.f32 %v1719_v4, %v1165_v1  ;;  %vm1172_vm9 = vweird.f32 %v1719_v4 }
0x1c7b   :  { %vm1173_vm11 = vmor %vm1171_vm10, %vm1172_vm9 }
0x1c7c   :  { %v1168_v6 = vsub.f32 1.0, %v1167_v5 }
0x1c7e   :  { %v1169_v8 = vmul.f32 %v1719_v4, %v1168_v6  ;;  %v850_v6 = vpop.f32.mrf.mxu0 }
0x1c80   :  { %v1170_v22 = vadd.f32 %v1719_v4, %v1169_v8  ;;  %v851_v8 = vadd.f32 %v2297_v57, %v850_v6 }
0x1c82   :  { %v1174_v25 = vsel %vm1173_vm11, %v1719_v4, %v1170_v22 }
0x1c83   :  { %v1179_v28 = vsel %vm1176_vm12, %v1178_v26, %v1174_v25 }
0x1c84   :  { %v1182_v30 = vmul.f32 %v1179_v28, %v1122_v62 }
0x1ce1   :  { %v1185_v27 = vpop.permute.xlu1 %1184 }
0x1ce2   :  { %v1187_v29 = vmul.f32 %v1185_v27, %v1179_v28 }
0x1ce4   :  { %1189 = vrot.lane.b32.xlu2 %v1187_v29, %s1854_s24 }
0x1d3e   :  { %v1190_v31 = vpop.permute.xlu2 %1189 }
0x1d3f   :  { %v2359_v32 = vadd.f32 %v1190_v31, %v1182_v30 }
0x1d41   :  { %1720 = vtanh.f32 %v2359_v32 }
0x1d47   :  { %v1721_v33 = vpop.eup %1720 }
0x1d48   :  { %v1197_v37 = vadd.f32 %v1721_v33, %v1195_v35 }
0x1d4a   :  { %1199 = vrot.lane.b32.xlu1 %v1197_v37, %s1854_s24 }
0x1dbc   :  { %v1200_v36 = vpop.permute.xlu1 %1199 }
0x1dbd   :  { %v1202_v38 = vmul.f32 %v1200_v36, %v1179_v28 }
0x1dbf   :  { %1204 = vrot.lane.b32.xlu2 %v1202_v38, %s1855_s6 }
0x1dc7   :  { %1264 = vrot.lane.b32.xlu2 %v2183_v48, %s1856_s0  ;;  %v1423_v48 = vld [vmem:[%s2480_s9] sm:$0xff] }
0x1dc8   :  { %1606 = vmatpush.msra.mxu3 %v1423_v48  ;;  %1462 = vmatpush.msra.mxu1 %v1423_v48 }
0x1dc9   :  { %1605 = vmatpush.msrb.mxu2 %v1423_v48 }
0x1e19   :  { %v1205_v44 = vpop.permute.xlu2 %1204 }
0x1e1a   :  { %v1207_v45 = vsel %vm214_vm1, %v1205_v44, %v2359_v32 }
0x1e1b   :  { %1585 = vmatmul.msk.f32.vlgmr.msrb.gmra.mxu3 %vm216_vm2, %v1207_v45 }
0x1e21   :  { %v1265_v15 = vpop.permute.xlu2 %1264 }
0x1e23   :  { %1595 = vmatmul.msk.f32.vlgmr.msra.gmra.mxu3 %vm214_vm1, %v1205_v44 }
0x1e9e   :  { %v1228_v39 = vpop.f32.mrf.mxu3 }
0x1e9f   :  { %v1231_v47 = vadd.f32 %v1228_v39, %v848_v42 }
0x1ea1   :  { %1722 = vtanh.f32 %v1231_v47  ;;  %v1586_v53 = vmul.f32 -1.442695, %v1231_v47 }
0x1ea3   :  { %1724 = vpow2.f32 %v1586_v53 }
0x1ea6   :  { %v1476_v50 = vpop.f32.mrf.mxu3 }
0x1ea7   :  { %v1723_v51 = vpop.eup %1722  ;;  %v1477_v52 = vadd.f32 %v2386_v49, %v1476_v50 }
0x1ea8   :  { %1254 = vrot.lane.b32.xlu0 %v1723_v51, %s1854_s24 }
0x1ea9   :  { %1493 = vst.msk [vmem:[%s2482_s11 + $0x20] sm:$0xff] %vm1488_vm13, %v1477_v52  ;;  %v1725_v54 = vpop.eup %1724 }
0x1eaa   :  { %v1235_v55 = vadd.f32 1.0, %v1725_v54 }
0x1eac   :  { %1726 = vrcp.f32 %v1235_v55  ;;  %v1247_v62 = vand.u32 2147483648, %v1235_v55  ;;  %vm1241_vm15 = vweird.f32 %v1235_v55  ;;  %v1245_v0 = vand.u32 2147483647, %v1235_v55 }
0x1eae   :  { %v1248_v10 = vor.u32 1.1754944e-38, %v1247_v62  ;;  %vm1246_vm3 = vcmp.eq.f32.partialorder %v1245_v0, 8.507059e+37 }
0x1eb2   :  { %v1727_v56 = vpop.eup %1726 }
0x1eb3   :  { %v1237_v58 = vmul.f32 %v1727_v56, %v1235_v55  ;;  %vm1242_vm14 = vweird.f32 %v1727_v56 }
0x1eb4   :  { %vm1243_vm0 = vmor %vm1241_vm15, %vm1242_vm14 }
0x1eb5   :  { %v1238_v59 = vsub.f32 1.0, %v1237_v58 }
0x1eb7   :  { %v1239_v60 = vmul.f32 %v1727_v56, %v1238_v59 }
0x1eb9   :  { %v1240_v61 = vadd.f32 %v1727_v56, %v1239_v60 }
0x1ebb   :  { %v1244_v9 = vsel %vm1243_vm0, %v1727_v56, %v1240_v61  ;;  %v853_v56 = vpop.f32.mrf.mxu0 }
0x1ebc   :  { %v1249_v13 = vsel %vm1246_vm3, %v1248_v10, %v1244_v9  ;;  %v854_v58 = vadd.f32 %v2297_v57, %v853_v56 }
0x1ebd   :  { %v1252_v17 = vmul.f32 %v1249_v13, %v2359_v32 }
0x1f1a   :  { %v1255_v12 = vpop.permute.xlu0 %1254 }
0x1f1b   :  { %v1257_v16 = vmul.f32 %v1255_v12, %v1249_v13 }
0x1f1d   :  { %1259 = vrot.lane.b32.xlu1 %v1257_v16, %s1854_s24 }
0x1f8f   :  { %v1260_v19 = vpop.permute.xlu1 %1259 }
0x1f90   :  { %v1262_v20 = vadd.f32 %v1260_v19, %v1252_v17 }
0x1f92   :  { %1728 = vtanh.f32 %v1262_v20 }
0x1f98   :  { %v1729_v2 = vpop.eup %1728 }
0x1f99   :  { %v1267_v21 = vadd.f32 %v1729_v2, %v1265_v15 }
0x1f9b   :  { %1269 = vrot.lane.b32.xlu0 %v1267_v21, %s1854_s24 }
0x200d   :  { %v1270_v3 = vpop.permute.xlu0 %1269 }
0x200e   :  { %v1272_v1 = vmul.f32 %v1270_v3, %v1249_v13 }
0x2010   :  { %1274 = vrot.lane.b32.xlu1 %v1272_v1, %s1855_s6 }
0x2018   :  { %1334 = vrot.lane.b32.xlu1 %v2196_v7, %s1856_s0 }
0x2082   :  { %v1275_v4 = vpop.permute.xlu1 %1274 }
0x2083   :  { %v1277_v5 = vsel %vm214_vm1, %v1275_v4, %v1262_v20  ;;  %1596 = vmatmul.msk.f32.gmra.mxu3 %vm214_vm1, %v1275_v4 }
0x2084   :  { %1587 = vmatmul.msk.f32.vlgmr.msrb.gmra.mxu1 %vm216_vm2, %v1277_v5 }
0x208a   :  { %v1335_v50 = vpop.permute.xlu1 %1334 }
0x208c   :  { %1591 = vmatmul.msk.f32.vlgmr.msra.gmra.mxu1 %vm214_vm1, %v2307_v34 }
0x2094   :  { %1592 = vmatmul.msk.f32.gmra.mxu1 %vm214_vm1, %v2327_v11 }
0x209c   :  { %1593 = vmatmul.msk.f32.gmra.mxu1 %vm214_vm1, %v2339_v18 }
0x2101   :  { %v1298_v7 = vpop.f32.mrf.mxu1 }
0x2102   :  { %v1301_v22 = vadd.f32 %v1298_v7, %v851_v8 }
0x2104   :  { %1730 = vtanh.f32 %v1301_v22  ;;  %v1588_v29 = vmul.f32 -1.442695, %v1301_v22 }
0x2106   :  { %v1479_v23 = vpop.f32.mrf.mxu3  ;;  %1732 = vpow2.f32 %v1588_v29 }
0x2107   :  { %v1480_v24 = vadd.f32 %v2386_v49, %v1479_v23 }
0x2109   :  { %1494 = vst.msk [vmem:[%s2482_s11 + $0x28] sm:$0xff] %vm1488_vm13, %v1480_v24  ;;  %v1464_v34 = vpop.f32.mrf.mxu1 }
0x210a   :  { %v1731_v25 = vpop.eup %1730  ;;  %v1465_v11 = vadd.f32 %v2386_v49, %v1464_v34 }
0x210b   :  { %1324 = vrot.lane.b32.xlu2 %v1731_v25, %s1854_s24 }
0x210c   :  { %1489 = vst.msk [vmem:[%s2482_s11] sm:$0xff] %vm1488_vm13, %v1465_v11  ;;  %v1733_v30 = vpop.eup %1732 }
0x210d   :  { %v1305_v31 = vadd.f32 1.0, %v1733_v30 }
0x210f   :  { %1734 = vrcp.f32 %v1305_v31  ;;  %v1317_v38 = vand.u32 2147483648, %v1305_v31  ;;  %vm1311_vm5 = vweird.f32 %v1305_v31  ;;  %v1315_v40 = vand.u32 2147483647, %v1305_v31 }
0x2111   :  { %v1467_v18 = vpop.f32.mrf.mxu1  ;;  %v1318_v43 = vor.u32 1.1754944e-38, %v1317_v38  ;;  %vm1316_vm7 = vcmp.eq.f32.partialorder %v1315_v40, 8.507059e+37 }
0x2112   :  { %v1468_v26 = vadd.f32 %v2386_v49, %v1467_v18 }
0x2114   :  { %1490 = vst.msk [vmem:[%s2482_s11 + $0x8] sm:$0xff] %vm1488_vm13, %v1468_v26 }
0x2115   :  { %v1735_v32 = vpop.eup %1734 }
0x2116   :  { %v1307_v33 = vmul.f32 %v1735_v32, %v1305_v31  ;;  %vm1312_vm4 = vweird.f32 %v1735_v32 }
0x2117   :  { %vm1313_vm6 = vmor %vm1311_vm5, %vm1312_vm4 }
0x2118   :  { %v1308_v35 = vsub.f32 1.0, %v1307_v33 }
0x2119   :  { %v1470_v27 = vpop.f32.mrf.mxu1 }
0x211a   :  { %v1471_v28 = vadd.f32 %v2386_v49, %v1470_v27  ;;  %v1309_v37 = vmul.f32 %v1735_v32, %v1308_v35 }
0x211c   :  { %1491 = vst.msk [vmem:[%s2482_s11 + $0x10] sm:$0xff] %vm1488_vm13, %v1471_v28  ;;  %v1310_v36 = vadd.f32 %v1735_v32, %v1309_v37 }
0x211e   :  { %v1314_v41 = vsel %vm1313_vm6, %v1735_v32, %v1310_v36 }
0x211f   :  { %v1319_v44 = vsel %vm1316_vm7, %v1318_v43, %v1314_v41 }
0x2120   :  { %v1322_v46 = vmul.f32 %v1319_v44, %v1262_v20 }
0x2165   :  { %v1325_v48 = vpop.permute.xlu2 %1324 }
0x2166   :  { %v1327_v45 = vmul.f32 %v1325_v48, %v1319_v44 }
0x2168   :  { %1329 = vrot.lane.b32.xlu0 %v1327_v45, %s1854_s24 }
0x21da   :  { %v1330_v42 = vpop.permute.xlu0 %1329 }
0x21db   :  { %v1332_v39 = vadd.f32 %v1330_v42, %v1322_v46 }
0x21dd   :  { %1736 = vtanh.f32 %v1332_v39 }
0x21e3   :  { %v1737_v47 = vpop.eup %1736 }
0x21e4   :  { %v1337_v51 = vadd.f32 %v1737_v47, %v1335_v50 }
0x21e6   :  { %1339 = vrot.lane.b32.xlu2 %v1337_v51, %s1854_s24 }
0x2240   :  { %v1340_v52 = vpop.permute.xlu2 %1339 }
0x2241   :  { %v1342_v53 = vmul.f32 %v1340_v52, %v1319_v44 }
0x2243   :  { %1344 = vrot.lane.b32.xlu0 %v1342_v53, %s1855_s6 }
0x224b   :  { %1404 = vrot.lane.b32.xlu0 %v2261_v63, %s1856_s0 }
0x22b5   :  { %v1345_v54 = vpop.permute.xlu0 %1344 }
0x22b6   :  { %v1347_v55 = vsel %vm214_vm1, %v1345_v54, %v1332_v39  ;;  %1597 = vmatmul.msk.f32.gmra.mxu3 %vm214_vm1, %v1345_v54 }
0x22b7   :  { %1589 = vmatmul.msk.f32.vlgmr.msra.gmra.mxu2 %vm216_vm2, %v1347_v55 }
0x22bd   :  { %v1405_v22 = vpop.permute.xlu0 %1404 }
0x22bf   :  { %1594 = vmatmul.msk.f32.vlgmr.msrb.gmra.mxu2 %vm214_vm1, %v2351_v14 }
0x2339   :  { %v1482_v59 = vpop.f32.mrf.mxu3 }
0x233a   :  { %v1483_v60 = vadd.f32 %v2386_v49, %v1482_v59  ;;  %v1368_v61 = vpop.f32.mrf.mxu2 }
0x233b   :  { %v1371_v62 = vadd.f32 %v1368_v61, %v854_v58 }
0x233c   :  { %1495 = vst.msk [vmem:[%s2482_s11 + $0x30] sm:$0xff] %vm1488_vm13, %v1483_v60 }
0x233d   :  { %1738 = vtanh.f32 %v1371_v62  ;;  %v1590_v57 = vmul.f32 -1.442695, %v1371_v62 }
0x233f   :  { %1740 = vpow2.f32 %v1590_v57 }
0x2342   :  { %v1473_v63 = vpop.f32.mrf.mxu2 }
0x2343   :  { %v1739_v0 = vpop.eup %1738  ;;  %v1474_v9 = vadd.f32 %v2386_v49, %v1473_v63 }
0x2344   :  { %1394 = vrot.lane.b32.xlu1 %v1739_v0, %s1854_s24 }
0x2345   :  { %1492 = vst.msk [vmem:[%s2482_s11 + $0x18] sm:$0xff] %vm1488_vm13, %v1474_v9  ;;  %v1741_v14 = vpop.eup %1740 }
0x2346   :  { %v1375_v10 = vadd.f32 1.0, %v1741_v14 }
0x2348   :  { %1742 = vrcp.f32 %v1375_v10  ;;  %v1387_v20 = vand.u32 2147483648, %v1375_v10  ;;  %vm1381_vm8 = vweird.f32 %v1375_v10  ;;  %v1385_v2 = vand.u32 2147483647, %v1375_v10 }
0x234a   :  { %v1388_v21 = vor.u32 1.1754944e-38, %v1387_v20  ;;  %vm1386_vm10 = vcmp.eq.f32.partialorder %v1385_v2, 8.507059e+37 }
0x234e   :  { %v1743_v12 = vpop.eup %1742 }
0x234f   :  { %v1377_v13 = vmul.f32 %v1743_v12, %v1375_v10  ;;  %vm1382_vm2 = vweird.f32 %v1743_v12 }
0x2350   :  { %vm1383_vm9 = vmor %vm1381_vm8, %vm1382_vm2 }
0x2351   :  { %v1378_v16 = vsub.f32 1.0, %v1377_v13 }
0x2353   :  { %v1379_v17 = vmul.f32 %v1743_v12, %v1378_v16 }
0x2355   :  { %v1380_v19 = vadd.f32 %v1743_v12, %v1379_v17 }
0x2357   :  { %v1384_v15 = vsel %vm1383_vm9, %v1743_v12, %v1380_v19 }
0x2358   :  { %v1389_v1 = vsel %vm1386_vm10, %v1388_v21, %v1384_v15 }
0x2359   :  { %v1392_v5 = vmul.f32 %v1389_v1, %v1332_v39 }
0x23b6   :  { %v1395_v3 = vpop.permute.xlu1 %1394 }
0x23b7   :  { %v1397_v4 = vmul.f32 %v1395_v3, %v1389_v1 }
0x23b9   :  { %1399 = vrot.lane.b32.xlu2 %v1397_v4, %s1854_s24 }
0x2413   :  { %v1400_v6 = vpop.permute.xlu2 %1399 }
0x2414   :  { %v1402_v8 = vadd.f32 %v1400_v6, %v1392_v5 }
0x2416   :  { %1744 = vtanh.f32 %v1402_v8  ;;  %1419 = vrot.lane.b32.xlu0 %v1402_v8, %s1856_s0 }
0x241c   :  { %v1745_v7 = vpop.eup %1744 }
0x241d   :  { %v1407_v23 = vadd.f32 %v1745_v7, %v1405_v22 }
0x241f   :  { %1409 = vrot.lane.b32.xlu1 %v1407_v23, %s1854_s24  ;;  %s1858_s24 = smov [#allocation8]  }
0x2420   :  { %s1515_s26 = sshll.u32 %s1858_s24, 4  ;;  %s1516_s26 = int_to_ptr.vmem [resolvable:$true] %s1515_s26 }
0x2488   :  { %v1420_v24 = vpop.permute.xlu0 %1419 }
0x2489   :  { %1422 = vst.msk [vmem:[#allocation8] sm:$0xff] %vm214_vm1, %v1420_v24 }
0x2491   :  { %v1410_v34 = vpop.permute.xlu1 %1409 }
0x2492   :  { %v1412_v25 = vmul.f32 %v1410_v34, %v1389_v1 }
0x2494   :  { %1414 = vrot.lane.b32.xlu2 %v1412_v25, %s1855_s6  ;;  %s1517_s6 = sshll.u32 %s2484_s13, 4  ;;  %s1518_s6 = int_to_ptr.hbm [resolvable:$true] %s1517_s6 }
0x2495   :  { %1520 = dma.vmem_to_hbm [thread:$0]  %s1516_s26, 128, %s1518_s6, [#allocation9]  }
0x24ee   :  { %v1415_v11 = vpop.permute.xlu2 %1414 }
0x24ef   :  { %1417 = vst.msk [vmem:[#allocation7] sm:$0xff] %vm214_vm1, %v1415_v11  ;;  %1598 = vmatmul.msk.f32.gmra.mxu3 %vm214_vm1, %v1415_v11 }
0x24f0   :  { %1509 = dma.vmem_to_hbm [thread:$0]  %s1505_s7, 128, %s1507_s25, [#allocation4]  }
0x2572   :  { %v1485_v18 = vpop.f32.mrf.mxu3 }
0x2573   :  { %v1486_v26 = vadd.f32 %v2386_v49, %v1485_v18 }
0x2575   :  { %1496 = vst.msk [vmem:[%s2482_s11 + $0x38] sm:$0xff] %vm1488_vm13, %v1486_v26 }
0x2576   :  { %1846 = dma.done.wait [#allocation4], 128  }
0x2577   :  { %1847 = vsyncadd [#allocation4], 4294967168 }
0x2578   :  { %1848 = dma.done.wait [#allocation9], 128  }
0x2579   :  { %1849 = vsyncadd [#allocation9], 4294967168 }
0x257a   :  { %1531 = vsyncpa [#allocation3], 1 }
0x257b   :  { %1532 = vsyncpa [#allocation6], 1 }
0x257c   :  { %1533 = vsyncpa [#allocation4], 1 }
0x257d   :  { %1534 = vsyncpa [#allocation9], 1 }

</bundles_post_ra>
